<compile_context>
chip_gen: v7x
topology: tpu7x:2x2x1
jax: 0.10.0
libtpu: 0.0.40
codegen_flags: <defaults>
</compile_context>

<pallas_src>
import jax
import jax.numpy as jnp
from jax.experimental import pallas as pl
from jax.experimental.pallas import tpu as pltpu

# TODO(synk): tokenizer.decode + SentenceTransformer encoding are host-side /
#             external-model steps with no Pallas equivalent; the kernel
#             consumes the 2048-d sentence embeddings directly.

INPUT_DIM = 2048
HIDDEN_DIM = 150
OUT_DIM = 2

HIDDEN_PAD = 256   # next multiple of 128 >= 150 (zero-padded, math is exact)
OUT_PAD = 128      # lane-dense padded output width (sliced back to 2 afterwards)


def _round_up(x, m):
    return (x + m - 1) // m * m


def _tfidf_head_kernel(x_ref, w1_ref, b1_ref, w2_ref, b2_ref, o_ref):
    # x_ref: (TB, 2048)   w1_ref: (2048, 256)  b1_ref: (1, 256)
    # w2_ref: (256, 128)  b2_ref: (1, 128)     o_ref: (TB, 128)
    h = jnp.dot(x_ref[...], w1_ref[...], preferred_element_type=jnp.float32)
    h = jnp.maximum(h + b1_ref[...], 0.0)                      # bias + relu
    o_ref[...] = (jnp.dot(h, w2_ref[...], preferred_element_type=jnp.float32)
                  + b2_ref[...])


def _build_call(B_pad, tile_b):
    return pl.pallas_call(
        _tfidf_head_kernel,
        out_shape=jax.ShapeDtypeStruct((B_pad, OUT_PAD), jnp.float32),
        grid_spec=pltpu.PrefetchScalarGridSpec(
            num_scalar_prefetch=0,
            grid=(B_pad // tile_b,),
            in_specs=[
                pl.BlockSpec((tile_b, INPUT_DIM), lambda i: (i, 0)),   # x tile
                pl.BlockSpec((INPUT_DIM, HIDDEN_PAD), lambda i: (0, 0)),  # w1
                pl.BlockSpec((1, HIDDEN_PAD), lambda i: (0, 0)),          # b1
                pl.BlockSpec((HIDDEN_PAD, OUT_PAD), lambda i: (0, 0)),    # w2
                pl.BlockSpec((1, OUT_PAD), lambda i: (0, 0)),             # b2
            ],
            out_specs=pl.BlockSpec((tile_b, OUT_PAD), lambda i: (i, 0)),
        ),
        compiler_params=pltpu.CompilerParams(
            dimension_semantics=("parallel",)),
    )


def lstm_embeddings_head(embeddings, offset, w1, b1, w2, b2, *, tile_b=None):
    """embeddings: [B, 2048] f32; offset: scalar (or [2048]) f32;
    w1: [2048, 150], b1: [1, 150], w2: [150, 2], b2: [1, 2]  (stored [in, out]).
    Returns logits [B, 2] f32 == TwoLayerTFIDF(embeddings - offset)."""
    B, D = embeddings.shape
    assert D == INPUT_DIM

    # Large row tiles keep the MXU busy; cap at 512 so double-buffered x tiles
    # (2 x 4 MiB) + weights (~4.5 MiB) stay comfortably inside default scoped
    # VMEM on v5e/v6e/v7x.
    if tile_b is None:
        tile_b = max(8, min(512, _round_up(B, 8)))
    assert tile_b % 8 == 0

    # Fold the offset subtraction into the first bias:
    #   (x - c) @ W1 + b1 = x @ W1 + (b1 - c @ W1)
    off = jnp.broadcast_to(jnp.asarray(offset, jnp.float32), (D,))
    b1_eff = (jnp.asarray(b1, jnp.float32).reshape(1, HIDDEN_DIM)
              - (off @ jnp.asarray(w1, jnp.float32))[None, :])

    # Pad params to lane-friendly widths (exact: padded cols are zero through
    # relu and hit zero rows of W2).
    w1p = jnp.zeros((D, HIDDEN_PAD), jnp.float32).at[:, :HIDDEN_DIM].set(
        jnp.asarray(w1, jnp.float32))
    b1p = jnp.zeros((1, HIDDEN_PAD), jnp.float32).at[:, :HIDDEN_DIM].set(b1_eff)
    w2p = jnp.zeros((HIDDEN_PAD, OUT_PAD), jnp.float32).at[:HIDDEN_DIM, :OUT_DIM].set(
        jnp.asarray(w2, jnp.float32))
    b2p = jnp.zeros((1, OUT_PAD), jnp.float32).at[:, :OUT_DIM].set(
        jnp.asarray(b2, jnp.float32).reshape(1, OUT_DIM))

    # Pad the batch so the grid has no ragged tail (padded rows sliced off below).
    B_pad = _round_up(B, tile_b)
    x = embeddings.astype(jnp.float32)
    if B_pad != B:
        x = jnp.pad(x, ((0, B_pad - B), (0, 0)))

    out = _build_call(B_pad, tile_b)(x, w1p, b1p, w2p, b2p)
    return out[:B, :OUT_DIM]


def reference_head(embeddings, offset, w1, b1, w2, b2):
    x = embeddings - offset
    h = jnp.maximum(x @ w1 + b1, 0.0)
    return h @ w2 + b2


if __name__ == "__main__":
    key = jax.random.PRNGKey(0)
    k_emb, k_w1, k_b1, k_w2, k_b2 = jax.random.split(key, 5)

    B = 20  # not a tile multiple when tile_b=8 -> exercises the padded ragged tail
    embeddings = jax.random.normal(k_emb, (B, INPUT_DIM), jnp.float32)
    offset = jnp.float32(0.1)

    # Deterministic synthetic parameters for TwoLayerTFIDF(2048, 150, None):
    # Linear(2048 -> 150) and Linear(150 -> 2); stored as [in, out] here.
    w1 = jax.random.normal(k_w1, (INPUT_DIM, HIDDEN_DIM), jnp.float32) * 0.02
    b1 = jax.random.normal(k_b1, (1, HIDDEN_DIM), jnp.float32) * 0.02
    w2 = jax.random.normal(k_w2, (HIDDEN_DIM, OUT_DIM), jnp.float32) * 0.02
    b2 = jax.random.normal(k_b2, (1, OUT_DIM), jnp.float32) * 0.02

    ref = reference_head(embeddings, offset, w1, b1, w2, b2)

    # Multi-step grid with a ragged tail (20 rows, 8-row tiles -> pad to 24).
    logits = lstm_embeddings_head(embeddings, offset, w1, b1, w2, b2, tile_b=8)
    jax.block_until_ready(logits)
    assert logits.shape == (B, OUT_DIM)
    assert jnp.allclose(logits, ref, atol=1e-4, rtol=1e-4), "mismatch (tile_b=8)"

    # Default (auto) tile-size path (single grid step).
    logits2 = lstm_embeddings_head(embeddings, offset, w1, b1, w2, b2)
    jax.block_until_ready(logits2)
    assert jnp.allclose(logits2, ref, atol=1e-4, rtol=1e-4), "mismatch (auto tile)"

    print("KERNEL_OK")
</pallas_src>

<mosaic_0001>
module attributes {stable_mosaic.version = 11 : i64} {
  func.func @_tfidf_head_kernel(%arg0: i32, %arg1: memref<8x2048xf32, #tpu.memory_space<vmem>>, %arg2: memref<2048x256xf32, #tpu.memory_space<vmem>>, %arg3: memref<1x256xf32, #tpu.memory_space<vmem>>, %arg4: memref<256x128xf32, #tpu.memory_space<vmem>>, %arg5: memref<1x128xf32, #tpu.memory_space<vmem>>, %arg6: memref<8x128xf32, #tpu.memory_space<vmem>>) attributes {dimension_semantics = [#tpu.dimension_semantics<parallel>], iteration_bounds = array<i64: 3>, scalar_prefetch = 0 : i64, scratch_operands = 0 : i64, tpu.core_type = #tpu.core_type<tc>, window_params = [{transform_indices = @transform_0, window_bounds = array<i64: 8, 2048>}, {pipeline_mode = #tpu.pipeline_mode<synchronous>, transform_indices = @transform_1, window_bounds = array<i64: 2048, 256>}, {pipeline_mode = #tpu.pipeline_mode<synchronous>, transform_indices = @transform_2, window_bounds = array<i64: 1, 256>}, {pipeline_mode = #tpu.pipeline_mode<synchronous>, transform_indices = @transform_3, window_bounds = array<i64: 256, 128>}, {pipeline_mode = #tpu.pipeline_mode<synchronous>, transform_indices = @transform_4, window_bounds = array<i64: 1, 128>}, {transform_indices = @transform_5, window_bounds = array<i64: 8, 128>}]} {
    %c0 = arith.constant 0 : index
    %c0_0 = arith.constant 0 : index
    %0 = vector.load %arg1[%c0, %c0_0] : memref<8x2048xf32, #tpu.memory_space<vmem>>, vector<8x2048xf32>
    %c0_1 = arith.constant 0 : index
    %c0_2 = arith.constant 0 : index
    %1 = vector.load %arg2[%c0_1, %c0_2] : memref<2048x256xf32, #tpu.memory_space<vmem>>, vector<2048x256xf32>
    %cst = arith.constant dense<0.000000e+00> : vector<8x256xf32>
    %2 = tpu.matmul %0, %1, %cst {dimension_numbers = #tpu.dot_dimension_numbers<[1], [0], [0], [1], [0, 0, 1, 1], [], []>} : vector<8x2048xf32>, vector<2048x256xf32>, vector<8x256xf32> -> vector<8x256xf32>
    %c0_3 = arith.constant 0 : index
    %c0_4 = arith.constant 0 : index
    %3 = vector.load %arg3[%c0_3, %c0_4] : memref<1x256xf32, #tpu.memory_space<vmem>>, vector<1x256xf32>
    %4 = vector.broadcast %3 : vector<1x256xf32> to vector<8x256xf32>
    %5 = arith.addf %2, %4 : vector<8x256xf32>
    %cst_5 = arith.constant 0.000000e+00 : f32
    %6 = vector.broadcast %cst_5 : f32 to vector<8x256xf32>
    %7 = arith.maximumf %5, %6 : vector<8x256xf32>
    %c0_6 = arith.constant 0 : index
    %c0_7 = arith.constant 0 : index
    %8 = vector.load %arg4[%c0_6, %c0_7] : memref<256x128xf32, #tpu.memory_space<vmem>>, vector<256x128xf32>
    %cst_8 = arith.constant dense<0.000000e+00> : vector<8x128xf32>
    %9 = tpu.matmul %7, %8, %cst_8 {dimension_numbers = #tpu.dot_dimension_numbers<[1], [0], [0], [1], [0, 0, 1, 1], [], []>} : vector<8x256xf32>, vector<256x128xf32>, vector<8x128xf32> -> vector<8x128xf32>
    %c0_9 = arith.constant 0 : index
    %c0_10 = arith.constant 0 : index
    %10 = vector.load %arg5[%c0_9, %c0_10] : memref<1x128xf32, #tpu.memory_space<vmem>>, vector<1x128xf32>
    %11 = vector.broadcast %10 : vector<1x128xf32> to vector<8x128xf32>
    %12 = arith.addf %9, %11 : vector<8x128xf32>
    %c0_11 = arith.constant 0 : index
    %c0_12 = arith.constant 0 : index
    %13 = vector.load %arg6[%c0_11, %c0_12] : memref<8x128xf32, #tpu.memory_space<vmem>>, vector<8x128xf32>
    tpu.vector_store %arg6[%c0_11, %c0_12], %12 {strides = array<i32>} : memref<8x128xf32, #tpu.memory_space<vmem>>, vector<8x128xf32>,
    return
  }
  func.func @transform_0(%arg0: i32) -> (i32, i32) {
    %c0_i32 = arith.constant 0 : i32
    %c0_i32_0 = arith.constant 0 : i32
    return %arg0, %c0_i32 : i32, i32
  }
  func.func @transform_1(%arg0: i32) -> (i32, i32) {
    %c0_i32 = arith.constant 0 : i32
    %c0_i32_0 = arith.constant 0 : i32
    %c0_i32_1 = arith.constant 0 : i32
    return %c0_i32, %c0_i32_0 : i32, i32
  }
  func.func @transform_2(%arg0: i32) -> (i32, i32) {
    %c0_i32 = arith.constant 0 : i32
    %c0_i32_0 = arith.constant 0 : i32
    %c0_i32_1 = arith.constant 0 : i32
    return %c0_i32, %c0_i32_0 : i32, i32
  }
  func.func @transform_3(%arg0: i32) -> (i32, i32) {
    %c0_i32 = arith.constant 0 : i32
    %c0_i32_0 = arith.constant 0 : i32
    %c0_i32_1 = arith.constant 0 : i32
    return %c0_i32, %c0_i32_0 : i32, i32
  }
  func.func @transform_4(%arg0: i32) -> (i32, i32) {
    %c0_i32 = arith.constant 0 : i32
    %c0_i32_0 = arith.constant 0 : i32
    %c0_i32_1 = arith.constant 0 : i32
    return %c0_i32, %c0_i32_0 : i32, i32
  }
  func.func @transform_5(%arg0: i32) -> (i32, i32) {
    %c0_i32 = arith.constant 0 : i32
    %c0_i32_0 = arith.constant 0 : i32
    return %arg0, %c0_i32 : i32, i32
  }
}

</mosaic_0001>

<bundles_post_ra>
// kernel: tpu_custom_call.1
= control target key start
LH: loop header
LB: loop body
LE: loop exit
PB: predicated region body
PF: predicated region fallthrough
CT: control target
= control target key end

     0   :  { %10 = vsyncpa [#allocation3], 0  ;;  %s2897_s0 = inlined_call_operand.hbm [shape: f32[24,2048], index: 0, kind: input, shape index: {}]   ;;  %s2898_s1 = inlined_call_operand.hbm [shape: f32[2048,256], index: 1, kind: input, shape index: {}]   ;;  %s2899_s2 = inlined_call_operand.hbm [shape: f32[1,256], index: 2, kind: input, shape index: {}]   ;;  %s2900_s3 = inlined_call_operand.hbm [shape: f32[256,128], index: 3, kind: input, shape index: {}]   ;;  %s2901_s4 = inlined_call_operand.hbm [shape: f32[1,128], index: 4, kind: input, shape index: {}]   ;;  %s2902_s5 = inlined_call_operand.hbm [shape: f32[24,128], index: 5, kind: output, shape index: {}]  }
   0x1   :  { %12 = vsyncpa [#allocation3 + $0x1], 0 }
   0x2   :  { %13 = vsyncpa [#allocation6], 0 }
   0x3   :  { %14 = vsyncpa [#allocation9], 0 }
   0x4   :  { %15 = vsyncpa [#allocation4], 0 }
   0x5   :  { %17 = vsyncpa [#allocation4 + $0x1], 0  ;;  %s2604_s18 = smov 0   ;;  %s2606_s19 = smov 0  }
   0x6   :  { %s2608_s20 = smov 0   ;;  %s2610_s21 = smov 0  }
   0x7 LB: > { %s2564_s22 = smov [#allocation5]   ;;  %s2625_s24 = sadd.s32 4294967295, %s2562_s21   ;;  %s2562_s21 = sphi %s2610_s21, %s2925_s21   ;;  %s2558_s20 = sphi %s2608_s20, %s2924_s20   ;;  %s2554_s19 = sphi %s2606_s19, %s2923_s19   ;;  %s2550_s18 = sphi %s2604_s18, %s2922_s18  }
   0x8   : > { %s176_s23 = sshll.u32 %s2564_s22, 4  ;;  %p1638_p0 = scmp.ge.s32.totalorder %s2562_s21, 1  ;;  %s2630_s23 = int_to_ptr.vmem [resolvable:$true] %s176_s23 }
   0x9   : > { %p2903_p1 = scmp.eq.s32.totalorder %s2625_s24, 0  ;;  %p164_p2 = scmp.lt.s32.totalorder %s2562_s21, 4 }
   0xa   : > { %s2565_s26 = smov [#allocation8]   ;;  %s2566_s29 = smov [#allocation7]  }
   0xb   : > { %p2632_p3 = pnand %p1638_p0, %p164_p2  ;;  %s200_s27 = sshll.u32 %s2565_s26, 4  ;;  %s2644_s27 = int_to_ptr.vmem [resolvable:$true] %s200_s27 }
   0xc   : > { %s2646_s30 = sshll.u32 %s2566_s29, 4  ;;  %s2346_s8 = scalar_lea.hbm %s2898_s1, 65536  ;;  %s191_s30 = int_to_ptr.vmem [resolvable:$true] %s2646_s30 }
   0xd   : > { %s2906_s25 = scalar_select %p2632_p3, 1, 0 }
   0xe   : > { %p2275_p4 = pneg %p2632_p3  ;;  %p2347_p6 = scmp.ne.s32.totalorder %s2898_s1, %s2346_s8 }
   0xf   : > { %p2353_p10 = scmp.lt.u32.totalorder %s2346_s8, %s2898_s1 }
  0x10   : > { %p2640_p5 = pnand %p2275_p4, %p2903_p1 }
  0x12   : > { %p2656_p7 = pneg %p2640_p5 }
  0x14   : > { %p2349_p8 = pnand %p2656_p7, %p2347_p6 }
  0x16   : > { %p2350_p9 = pneg %p2349_p8 }
  0x18   : > { %p2355_p11 = pnand %p2353_p10, %p2350_p9 }
  0x1a   : > { %2358 = shalt.err (!%p2355_p11)
}
  0x1b   : > { %s2359_s14 = scalar_lea.vmem %s2630_s23, 65536  ;;  %p2367_p2 = scmp.lt.s32.totalorder %s2630_s23, %s2630_s23 }
  0x1c   : > { %p2360_p12 = scmp.ne.s32.totalorder %s2630_s23, %s2359_s14  ;;  %p2368_p4 = scmp.lt.s32.totalorder %s2359_s14, %s2359_s14 }
  0x1e   : > { %p2362_p13 = pnand %p2360_p12, %p2656_p7  ;;  %p2369_p6 = por %p2368_p4, %p2367_p2 }
  0x20   : > { %p2363_p0 = pneg %p2362_p13 }
  0x22   : > { %p2370_p8 = pnand %p2369_p6, %p2363_p0 }
  0x24   : > { %2373 = shalt.err (!%p2370_p8)
}
  0x25   : > { %s2567_s15 = smov 256   ;;  %s2568_s16 = smov 16  }
  0x26   : > { %2278 = dma.hbm_to_vmem [thread:$0]  (!%p2640_p5), %s2898_s1, 65536, %s2630_s23, [#allocation6], %s2567_s15, %s2567_s15, %s2568_s16  }
  0x27   : > { %s2374_s6 = scalar_lea.hbm %s2900_s3, 4096 }
  0x28   : > { %p2375_p9 = scmp.ne.s32.totalorder %s2900_s3, %s2374_s6  ;;  %p2381_p12 = scmp.lt.u32.totalorder %s2374_s6, %s2900_s3 }
  0x2a   : > { %p2377_p10 = pnand %p2375_p9, %p2656_p7 }
  0x2c   : > { %p2378_p11 = pneg %p2377_p10 }
  0x2e   : > { %p2383_p13 = pnand %p2381_p12, %p2378_p11 }
  0x30   : > { %2386 = shalt.err (!%p2383_p13)
}
  0x31   : > { %s2387_s23 = scalar_lea.vmem %s2644_s27, 4096  ;;  %p2395_p6 = scmp.lt.s32.totalorder %s2644_s27, %s2644_s27 }
  0x32   : > { %p2388_p0 = scmp.ne.s32.totalorder %s2644_s27, %s2387_s23  ;;  %p2396_p8 = scmp.lt.s32.totalorder %s2387_s23, %s2387_s23 }
  0x34   : > { %p2390_p2 = pnand %p2388_p0, %p2656_p7  ;;  %p2397_p9 = por %p2396_p8, %p2395_p6 }
  0x36   : > { %p2391_p4 = pneg %p2390_p2 }
  0x38   : > { %p2398_p10 = pnand %p2397_p9, %p2391_p4 }
  0x3a   : > { %2401 = shalt.err (!%p2398_p10)
}
  0x3b   : > { %s2569_s12 = smov 128   ;;  %s2570_s13 = smov 8  }
  0x3c   : > { %2284 = dma.hbm_to_vmem [thread:$0]  (!%p2640_p5), %s2900_s3, 4096, %s2644_s27, [#allocation9], %s2569_s12, %s2569_s12, %s2570_s13  }
  0x3d   : > { %s2402_s22 = scalar_lea.hbm %s2899_s2, 32 }
  0x3e   : > { %p2403_p11 = scmp.ne.s32.totalorder %s2899_s2, %s2402_s22  ;;  %p2409_p0 = scmp.lt.u32.totalorder %s2402_s22, %s2899_s2 }
  0x40   : > { %p2405_p12 = pnand %p2403_p11, %p2656_p7 }
  0x42   : > { %p2406_p13 = pneg %p2405_p12 }
  0x44   : > { %p2411_p2 = pnand %p2409_p0, %p2406_p13 }
  0x46   : > { %2414 = shalt.err (!%p2411_p2)
}
  0x47   : > { %s2415_s8 = scalar_lea.vmem %s191_s30, 32  ;;  %p2423_p9 = scmp.lt.s32.totalorder %s191_s30, %s191_s30 }
  0x48   : > { %p2416_p4 = scmp.ne.s32.totalorder %s191_s30, %s2415_s8  ;;  %p2424_p10 = scmp.lt.s32.totalorder %s2415_s8, %s2415_s8 }
  0x4a   : > { %p2418_p6 = pnand %p2416_p4, %p2656_p7  ;;  %p2425_p1 = por %p2424_p10, %p2423_p9 }
  0x4c   : > { %p2419_p8 = pneg %p2418_p6 }
  0x4e   : > { %p2426_p3 = pnand %p2425_p1, %p2419_p8 }
  0x50   : > { %2429 = shalt.err (!%p2426_p3)
}
  0x51   : > { %2281 = dma.hbm_to_vmem [thread:$0]  (!%p2640_p5), %s2899_s2, 32, %s191_s30, [#allocation6]  }
  0x52   : > { %s2571_s10 = smov [#allocation10]   ;;  %s2430_s14 = scalar_lea.hbm %s2901_s4, 16 }
  0x53   : > { %s214_s23 = sshll.u32 %s2571_s10, 4  ;;  %p2431_p11 = scmp.ne.s32.totalorder %s2901_s4, %s2430_s14  ;;  %s215_s23 = int_to_ptr.vmem [resolvable:$true] %s214_s23 }
  0x54   : > { %p2437_p12 = scmp.lt.u32.totalorder %s2430_s14, %s2901_s4 }
  0x55   : > { %p2433_p1 = pnand %p2431_p11, %p2656_p7 }
  0x57   : > { %p2434_p3 = pneg %p2433_p1 }
  0x59   : > { %p2439_p13 = pnand %p2437_p12, %p2434_p3 }
  0x5b   : > { %2442 = shalt.err (!%p2439_p13)
}
  0x5c   : > { %s2443_s30 = scalar_lea.vmem %s215_s23, 16  ;;  %s2450_s26 = scalar_lea.vmem %s215_s23, 32 }
  0x5d   : > { %p2444_p0 = scmp.ne.s32.totalorder %s215_s23, %s2443_s30  ;;  %p2451_p6 = scmp.lt.s32.totalorder %s215_s23, %s215_s23 }
  0x5e   : > { %p2452_p8 = scmp.lt.s32.totalorder %s2450_s26, %s2443_s30 }
  0x5f   : > { %p2446_p2 = pnand %p2444_p0, %p2656_p7 }
  0x60   : > { %p2453_p9 = por %p2452_p8, %p2451_p6 }
  0x61   : > { %p2447_p4 = pneg %p2446_p2 }
  0x63   : > { %p2454_p10 = pnand %p2453_p9, %p2447_p4 }
  0x65   : > { %2457 = shalt.err (!%p2454_p10)
}
  0x66   : > { %2287 = dma.hbm_to_vmem [thread:$0]  (!%p2640_p5), %s2901_s4, 16, %s215_s23, [#allocation9]  }
  0x67   : > { %s1637_s11 = sadd.s32 4294967294, %s2562_s21   ;;  %s2739_s28 = sadd.s32 1, %s2562_s21  }
  0x68   : > { %s27_s7 = ssub.s32 %s2562_s21, %s2739_s28  ;;  %s30_s8 = sadd.s32 1, %s2558_s20 }
  0x69   : > { %p28_p7 = scmp.eq.s32.totalorder %s27_s7, 0  ;;  %p37_p11 = scmp.ne.s32.totalorder %s2558_s20, %s2554_s19 }
  0x6a   : > { %p38_p1 = scmp.eq.s32.totalorder %s2562_s21, 0  ;;  %p43_p3 = scmp.ne.s32.totalorder %s2554_s19, %s2550_s18 }
  0x6b   : > { %s2750_s27 = scalar_select %p28_p7, %s2558_s20, %s30_s8  }
  0x6c   : > { %p2752_p12 = por %p38_p1, %p37_p11  ;;  %p2910_p13 = scmp.eq.s32.totalorder %s2625_s24, 0 }
  0x6d   : > { %p151_p0 = scmp.eq.s32.totalorder %s2625_s24, 2  ;;  %p157_p2 = scmp.eq.s32.totalorder %s1637_s11, 2 }
  0x6e   : > { %p2758_p5 = por %p2910_p13, %p43_p3  ;;  %p2300_p4 = scmp.lt.s32.totalorder %s2562_s21, 3 }
  0x6f   : > { %s225_s23 = sand.u32 1, %s2558_s20   ;;  %p2765_p6 = por %p151_p0, %p37_p11 }
  0x70   : > { %p2769_p8 = por %p157_p2, %p43_p3  ;;  %s1644_s14 = sshll.u32 %s225_s23, 7 }
  0x71   : > { %s2912_s12 = scalar_select %p2765_p6, 1, 0 }
  0x72   : > { %s2913_s13 = scalar_select %p2769_p8, 1, 0 }
  0x73   : > { %s1659_s15 = sshll.u32 %s2562_s21, 11  ;;  %s229_s30 = scalar_lea.vmem [#allocation2], %s1644_s14 }
  0x74   : > { %s2777_s22 = scalar_lea.hbm %s2897_s0, %s1659_s15  ;;  %s237_s26 = sshll.u32 %s229_s30, 4  ;;  %s2779_s26 = int_to_ptr.vmem [resolvable:$true] %s237_s26 }
  0x75   : > { %p2783_p9 = pnand %p2300_p4, %p2752_p12  ;;  %s226_s6 = scalar_lea.sflag [#allocation3], %s225_s23 }
  0x76   : > { %s2458_s11 = scalar_lea.hbm %s2777_s22, 2048  ;;  %s2463_s14 = scalar_lea.hbm %s2897_s0, 6144 }
  0x77   : > { %p2459_p10 = scmp.ne.s32.totalorder %s2777_s22, %s2458_s11  ;;  %p2460_p7 = pneg %p2783_p9 }
  0x78   : > { %p2464_p3 = scmp.lt.u32.totalorder %s2777_s22, %s2897_s0  ;;  %p2465_p12 = scmp.lt.u32.totalorder %s2463_s14, %s2458_s11 }
  0x79   : > { %p2461_p11 = pnand %p2460_p7, %p2459_p10  ;;  %p2467_p0 = scmp.lt.u32.totalorder %s2458_s11, %s2777_s22 }
  0x7a   : > { %p2466_p13 = por %p2465_p12, %p2464_p3 }
  0x7b   : > { %p2462_p1 = pneg %p2461_p11 }
  0x7c   : > { %p2468_p2 = por %p2467_p0, %p2466_p13 }
  0x7e   : > { %p2469_p4 = pnand %p2468_p2, %p2462_p1 }
  0x80   : > { %2472 = shalt.err (!%p2469_p4)
}
  0x81   : > { %s2473_s23 = scalar_lea.vmem %s2779_s26, 2048  ;;  %s2572_s16 = smov [#allocation2]  }
  0x82   : > { %p2474_p10 = scmp.ne.s32.totalorder %s2779_s26, %s2473_s23  ;;  %s2478_s17 = sshll.u32 %s2572_s16, 4  ;;  %s2479_s17 = int_to_ptr.vmem [resolvable:$false] %s2478_s17 }
  0x83   : > { %s2480_s30 = scalar_lea.vmem %s2479_s17, 4096  ;;  %p2481_p6 = scmp.lt.s32.totalorder %s2779_s26, %s2479_s17 }
  0x84   : > { %p2476_p11 = pnand %p2474_p10, %p2460_p7  ;;  %p2482_p3 = scmp.lt.s32.totalorder %s2480_s30, %s2473_s23 }
  0x86   : > { %p2477_p8 = pneg %p2476_p11  ;;  %p2483_p12 = por %p2482_p3, %p2481_p6 }
  0x88   : > { %p2484_p13 = pnand %p2483_p12, %p2477_p8 }
  0x8a   : > { %2487 = shalt.err (!%p2484_p13)
}
  0x8b   : > { %2291 = dma.hbm_to_vmem [thread:$0]  (!%p2783_p9), %s2777_s22, 2048, %s2779_s26, %s226_s6  }
  0x8c   : > { %p2915_p1 = scmp.ne.s32.totalorder %s2906_s25, 0 }
  0x8d   : > { %s2815_s11 = sand.u32 (!%p2915_p1), 1, %s2554_s19  }
  0x8e   : > { %246 = sbr.rel (%p2915_p1) target bundleno = 867 (0x363), region = 40  ;;  %s1648_s7 = sshll.u32 (!%p2915_p1), %s2815_s11, 7 }
  0x8f   : > { %s249_s8 = scalar_lea.sflag (!%p2915_p1), [#allocation3], %s2815_s11  ;;  %s2819_s14 = scalar_lea.vmem (!%p2915_p1), [#allocation2], %s1648_s7 }
  0x95   : > { %2533 = dma.done.wait (%p2758_p5), %s249_s8, 2048  }
  0x96   : > { %2535 = vsyncadd (%p2758_p5), %s249_s8, 4294965248  ;;  %p2916_p6 = scmp.eq.s32.totalorder %s2625_s24, 0 }
  0x98   : > { %2537 = dma.done.wait (%p2916_p6), [#allocation6], 65568   ;;  %p2917_p8 = pmov %p2916_p6 }
  0x99   : > { %p2918_p9 = pmov %p2916_p6 }
  0x9a   : > { %2539 = vsyncadd (%p2917_p8), [#allocation6], 4294901728 }
  0x9b   : > { %2541 = dma.done.wait (%p2918_p9), [#allocation9], 4112   ;;  %p2919_p7 = pmov %p2916_p6 }
  0x9c   : > { %v312_v0 = vld [vmem:[#allocation5 + $0x8] sm:$0xff]  ;;  %v314_v1 = vld [vmem:[#allocation5 + $0x18] sm:$0xff]  ;;  %v311_v5 = vld [vmem:[#allocation5] sm:$0xff]  ;;  %s1653_s25 = sshll.u32 %s2815_s11, 3  ;;  %s1656_s10 = sshll.u32 %s2625_s24, 7 }
  0x9d   : > { %2543 = vsyncadd (%p2919_p7), [#allocation9], 4294963184  ;;  %v568_v2 = vld [vmem:[#allocation5 + $0x808] sm:$0xff]  ;;  %v1695_v3 = vpack.c.bf16 %v314_v1, %v312_v0  ;;  %v570_v4 = vld [vmem:[#allocation5 + $0x818] sm:$0xff]  ;;  %s294_s22 = scalar_lea.vmem [#allocation11], %s1653_s25  ;;  %s2854_s9 = scalar_lea.hbm %s2902_s5, %s1656_s10 }
  0x9e   : > { %v313_v6 = vld [vmem:[#allocation5 + $0x10] sm:$0xff]  ;;  %v1951_v7 = vpack.c.bf16 %v570_v4, %v568_v2  ;;  %v567_v9 = vld [vmem:[#allocation5 + $0x800] sm:$0xff]  ;;  %v316_v11 = vld [vmem:[#allocation5 + $0x28] sm:$0xff]  ;;  %s1529_s26 = sshll.u32 %s294_s22, 4  ;;  %s1516_s15 = scalar_lea.sflag [#allocation4], %s2815_s11  ;;  %s2856_s26 = int_to_ptr.vmem [resolvable:$true] %s1529_s26 }
  0x9f   : > { %v1697_v8 = vpack.c.bf16 %v313_v6, %v311_v5  ;;  %v569_v10 = vld [vmem:[#allocation5 + $0x810] sm:$0xff]  ;;  %1696 = vmatprep.subr.bf16.mxu1 %v1695_v3  ;;  %v318_v13 = vld [vmem:[#allocation5 + $0x38] sm:$0xff]  ;;  %v572_v14 = vld [vmem:[#allocation5 + $0x828] sm:$0xff]  ;;  %s2488_s23 = scalar_lea.vmem %s2856_s26, 128  ;;  %p2920_p0 = scmp.ne.s32.totalorder %s2912_s12, 0 }
  0xa0   : > { %v1953_v12 = vpack.c.bf16 %v569_v10, %v567_v9  ;;  %v574_v15 = vld [vmem:[#allocation5 + $0x838] sm:$0xff]  ;;  %1952 = vmatprep.subr.bf16.mxu0 %v1951_v7  ;;  %v1699_v16 = vpack.c.bf16 %v318_v13, %v316_v11  ;;  %v315_v18 = vld [vmem:[#allocation5 + $0x20] sm:$0xff]  ;;  %v317_v19 = vld [vmem:[#allocation5 + $0x30] sm:$0xff]  ;;  %p2489_p5 = scmp.ne.s32.totalorder %s2856_s26, %s2488_s23  ;;  %s2573_s24 = smov [#allocation11]  }
  0xa1   : > { %1698 = vmatpush1.bf16.msra.mxu1 %v1697_v8  ;;  %v1955_v17 = vpack.c.bf16 %v574_v15, %v572_v14  ;;  %v571_v20 = vld [vmem:[#allocation5 + $0x820] sm:$0xff]  ;;  %v1701_v21 = vpack.c.bf16 %v317_v19, %v315_v18  ;;  %v573_v22 = vld [vmem:[#allocation5 + $0x830] sm:$0xff]  ;;  %v320_v23 = vld [vmem:[#allocation5 + $0x48] sm:$0xff]  ;;  %s2492_s16 = sshll.u32 %s2573_s24, 4  ;;  %s2493_s16 = int_to_ptr.vmem [resolvable:$false] %s2492_s16 }
  0xa2   : > { %1954 = vmatpush1.bf16.msra.mxu0 %v1953_v12  ;;  %v322_v24 = vld [vmem:[#allocation5 + $0x58] sm:$0xff]  ;;  %1700 = vmatprep.subr.bf16.mxu1 %v1699_v16  ;;  %v1957_v25 = vpack.c.bf16 %v573_v22, %v571_v20  ;;  %v576_v27 = vld [vmem:[#allocation5 + $0x848] sm:$0xff]  ;;  %v319_v29 = vld [vmem:[#allocation5 + $0x40] sm:$0xff]  ;;  %p2490_p2 = pnand %p2489_p5, %p2920_p0  ;;  %s2494_s17 = scalar_lea.vmem %s2493_s16, 256 }
  0xa3   : > { %1956 = vmatprep.subr.bf16.mxu0 %v1955_v17  ;;  %v1703_v26 = vpack.c.bf16 %v322_v24, %v320_v23  ;;  %v578_v28 = vld [vmem:[#allocation5 + $0x858] sm:$0xff]  ;;  %v321_v31 = vld [vmem:[#allocation5 + $0x50] sm:$0xff]  ;;  %v575_v32 = vld [vmem:[#allocation5 + $0x840] sm:$0xff]  ;;  %p2495_p10 = scmp.lt.s32.totalorder %s2856_s26, %s2493_s16  ;;  %p2496_p11 = scmp.lt.s32.totalorder %s2494_s17, %s2488_s23 }
  0xa4   : > { %v1959_v30 = vpack.c.bf16 %v578_v28, %v576_v27  ;;  %v577_v33 = vld [vmem:[#allocation5 + $0x850] sm:$0xff]  ;;  %v1705_v34 = vpack.c.bf16 %v321_v31, %v319_v29  ;;  %v324_v35 = vld [vmem:[#allocation5 + $0x68] sm:$0xff]  ;;  %v326_v36 = vld [vmem:[#allocation5 + $0x78] sm:$0xff]  ;;  %p2491_p4 = pneg %p2490_p2 }
  0xa5   : > { %1702 = vmatpush1.bf16.msra.mxu1 %v1701_v21  ;;  %v580_v37 = vld [vmem:[#allocation5 + $0x868] sm:$0xff]  ;;  %v1961_v38 = vpack.c.bf16 %v577_v33, %v575_v32  ;;  %v1707_v39 = vpack.c.bf16 %v326_v36, %v324_v35  ;;  %v582_v40 = vld [vmem:[#allocation5 + $0x878] sm:$0xff]  ;;  %v323_v41 = vld [vmem:[#allocation5 + $0x60] sm:$0xff]  ;;  %p2497_p3 = por %p2496_p11, %p2495_p10 }
  0xa6   : > { %1958 = vmatpush1.bf16.msra.mxu0 %v1957_v25  ;;  %1704 = vmatprep.subr.bf16.mxu1 %v1703_v26  ;;  %v325_v42 = vld [vmem:[#allocation5 + $0x70] sm:$0xff]  ;;  %v1963_v43 = vpack.c.bf16 %v582_v40, %v580_v37  ;;  %v579_v44 = vld [vmem:[#allocation5 + $0x860] sm:$0xff]  ;;  %v328_v46 = vld [vmem:[#allocation5 + $0x88] sm:$0xff] }
  0xa7   : > { %1960 = vmatprep.subr.bf16.mxu0 %v1959_v30  ;;  %v581_v45 = vld [vmem:[#allocation5 + $0x870] sm:$0xff]  ;;  %v330_v47 = vld [vmem:[#allocation5 + $0x98] sm:$0xff]  ;;  %v584_v48 = vld [vmem:[#allocation5 + $0x888] sm:$0xff]  ;;  %v1709_v50 = vpack.c.bf16 %v325_v42, %v323_v41  ;;  %p2498_p12 = pnand %p2497_p3, %p2491_p4 }
  0xa8   : > { %v586_v49 = vld [vmem:[#allocation5 + $0x898] sm:$0xff]  ;;  %v1965_v51 = vpack.c.bf16 %v581_v45, %v579_v44  ;;  %v1711_v52 = vpack.c.bf16 %v330_v47, %v328_v46  ;;  %v327_v53 = vld [vmem:[#allocation5 + $0x80] sm:$0xff]  ;;  %v329_v54 = vld [vmem:[#allocation5 + $0x90] sm:$0xff] }
  0xa9   : > { %1706 = vmatpush1.bf16.msra.mxu1 %v1705_v34  ;;  %v583_v55 = vld [vmem:[#allocation5 + $0x880] sm:$0xff]  ;;  %v1967_v56 = vpack.c.bf16 %v586_v49, %v584_v48  ;;  %v585_v57 = vld [vmem:[#allocation5 + $0x890] sm:$0xff]  ;;  %v332_v58 = vld [vmem:[#allocation5 + $0xa8] sm:$0xff]  ;;  %v1713_v62 = vpack.c.bf16 %v329_v54, %v327_v53 }
  0xaa   : > { %1962 = vmatpush1.bf16.msra.mxu0 %v1961_v38  ;;  %1708 = vmatprep.subr.bf16.mxu1 %v1707_v39  ;;  %v334_v59 = vld [vmem:[#allocation5 + $0xb8] sm:$0xff]  ;;  %v588_v60 = vld [vmem:[#allocation5 + $0x8a8] sm:$0xff]  ;;  %v1969_v63 = vpack.c.bf16 %v585_v57, %v583_v55  ;;  %v331_v1 = vld [vmem:[#allocation5 + $0xa0] sm:$0xff] }
  0xab   : > { %1964 = vmatprep.subr.bf16.mxu0 %v1963_v43  ;;  %v590_v61 = vld [vmem:[#allocation5 + $0x8b8] sm:$0xff]  ;;  %v1715_v0 = vpack.c.bf16 %v334_v59, %v332_v58  ;;  %v333_v2 = vld [vmem:[#allocation5 + $0xb0] sm:$0xff]  ;;  %v587_v3 = vld [vmem:[#allocation5 + $0x8a0] sm:$0xff] }
  0xac   : > { %v1971_v4 = vpack.c.bf16 %v590_v61, %v588_v60  ;;  %v589_v5 = vld [vmem:[#allocation5 + $0x8b0] sm:$0xff]  ;;  %v336_v6 = vld [vmem:[#allocation5 + $0xc8] sm:$0xff]  ;;  %v338_v7 = vld [vmem:[#allocation5 + $0xd8] sm:$0xff]  ;;  %v1717_v10 = vpack.c.bf16 %v333_v2, %v331_v1 }
  0xad   : > { %1710 = vmatpush1.bf16.msra.mxu1 %v1709_v50  ;;  %v592_v8 = vld [vmem:[#allocation5 + $0x8c8] sm:$0xff]  ;;  %v594_v9 = vld [vmem:[#allocation5 + $0x8d8] sm:$0xff]  ;;  %v1973_v11 = vpack.c.bf16 %v589_v5, %v587_v3  ;;  %v1719_v12 = vpack.c.bf16 %v338_v7, %v336_v6  ;;  %v335_v13 = vld [vmem:[#allocation5 + $0xc0] sm:$0xff] }
  0xae   : > { %1966 = vmatpush1.bf16.msra.mxu0 %v1965_v51  ;;  %1712 = vmatprep.subr.bf16.mxu1 %v1711_v52  ;;  %v337_v14 = vld [vmem:[#allocation5 + $0xd0] sm:$0xff]  ;;  %v591_v15 = vld [vmem:[#allocation5 + $0x8c0] sm:$0xff]  ;;  %v1975_v16 = vpack.c.bf16 %v594_v9, %v592_v8  ;;  %v340_v18 = vld [vmem:[#allocation5 + $0xe8] sm:$0xff] }
  0xaf   : > { %1968 = vmatprep.subr.bf16.mxu0 %v1967_v56  ;;  %v593_v17 = vld [vmem:[#allocation5 + $0x8d0] sm:$0xff]  ;;  %v342_v19 = vld [vmem:[#allocation5 + $0xf8] sm:$0xff]  ;;  %v596_v20 = vld [vmem:[#allocation5 + $0x8e8] sm:$0xff]  ;;  %v1721_v22 = vpack.c.bf16 %v337_v14, %v335_v13 }
  0xb0   : > { %v598_v21 = vld [vmem:[#allocation5 + $0x8f8] sm:$0xff]  ;;  %v1977_v23 = vpack.c.bf16 %v593_v17, %v591_v15  ;;  %v1723_v24 = vpack.c.bf16 %v342_v19, %v340_v18  ;;  %v339_v25 = vld [vmem:[#allocation5 + $0xe0] sm:$0xff]  ;;  %v341_v26 = vld [vmem:[#allocation5 + $0xf0] sm:$0xff] }
  0xb1   : > { %1714 = vmatpush1.bf16.msra.mxu1 %v1713_v62  ;;  %v595_v27 = vld [vmem:[#allocation5 + $0x8e0] sm:$0xff]  ;;  %v1979_v28 = vpack.c.bf16 %v598_v21, %v596_v20  ;;  %v597_v29 = vld [vmem:[#allocation5 + $0x8f0] sm:$0xff]  ;;  %v344_v30 = vld [vmem:[#allocation5 + $0x108] sm:$0xff]  ;;  %v1725_v34 = vpack.c.bf16 %v341_v26, %v339_v25 }
  0xb2   : > { %1970 = vmatpush1.bf16.msra.mxu0 %v1969_v63  ;;  %1716 = vmatprep.subr.bf16.mxu1 %v1715_v0  ;;  %v346_v31 = vld [vmem:[#allocation5 + $0x118] sm:$0xff]  ;;  %v600_v32 = vld [vmem:[#allocation5 + $0x908] sm:$0xff]  ;;  %v1981_v35 = vpack.c.bf16 %v597_v29, %v595_v27  ;;  %v343_v37 = vld [vmem:[#allocation5 + $0x100] sm:$0xff] }
  0xb3   : > { %1972 = vmatprep.subr.bf16.mxu0 %v1971_v4  ;;  %v602_v33 = vld [vmem:[#allocation5 + $0x918] sm:$0xff]  ;;  %v1727_v36 = vpack.c.bf16 %v346_v31, %v344_v30  ;;  %v345_v38 = vld [vmem:[#allocation5 + $0x110] sm:$0xff]  ;;  %v599_v39 = vld [vmem:[#allocation5 + $0x900] sm:$0xff] }
  0xb4   : > { %v1983_v40 = vpack.c.bf16 %v602_v33, %v600_v32  ;;  %v601_v41 = vld [vmem:[#allocation5 + $0x910] sm:$0xff]  ;;  %v348_v42 = vld [vmem:[#allocation5 + $0x128] sm:$0xff]  ;;  %v350_v43 = vld [vmem:[#allocation5 + $0x138] sm:$0xff]  ;;  %v1729_v46 = vpack.c.bf16 %v345_v38, %v343_v37 }
  0xb5   : > { %1718 = vmatpush1.bf16.msra.mxu1 %v1717_v10  ;;  %v604_v44 = vld [vmem:[#allocation5 + $0x928] sm:$0xff]  ;;  %v606_v45 = vld [vmem:[#allocation5 + $0x938] sm:$0xff]  ;;  %v1985_v47 = vpack.c.bf16 %v601_v41, %v599_v39  ;;  %v1731_v48 = vpack.c.bf16 %v350_v43, %v348_v42  ;;  %v347_v49 = vld [vmem:[#allocation5 + $0x120] sm:$0xff] }
  0xb6   : > { %1974 = vmatpush1.bf16.msra.mxu0 %v1973_v11  ;;  %1720 = vmatprep.subr.bf16.mxu1 %v1719_v12  ;;  %v349_v50 = vld [vmem:[#allocation5 + $0x130] sm:$0xff]  ;;  %v603_v51 = vld [vmem:[#allocation5 + $0x920] sm:$0xff]  ;;  %v1987_v52 = vpack.c.bf16 %v606_v45, %v604_v44  ;;  %v352_v54 = vld [vmem:[#allocation5 + $0x148] sm:$0xff] }
  0xb7   : > { %1976 = vmatprep.subr.bf16.mxu0 %v1975_v16  ;;  %v605_v53 = vld [vmem:[#allocation5 + $0x930] sm:$0xff]  ;;  %v354_v55 = vld [vmem:[#allocation5 + $0x158] sm:$0xff]  ;;  %v608_v56 = vld [vmem:[#allocation5 + $0x948] sm:$0xff]  ;;  %v1733_v58 = vpack.c.bf16 %v349_v50, %v347_v49 }
  0xb8   : > { %v610_v57 = vld [vmem:[#allocation5 + $0x958] sm:$0xff]  ;;  %v1989_v59 = vpack.c.bf16 %v605_v53, %v603_v51  ;;  %v1735_v60 = vpack.c.bf16 %v354_v55, %v352_v54  ;;  %v351_v61 = vld [vmem:[#allocation5 + $0x140] sm:$0xff]  ;;  %v353_v62 = vld [vmem:[#allocation5 + $0x150] sm:$0xff] }
  0xb9   : > { %1722 = vmatpush1.bf16.msra.mxu1 %v1721_v22  ;;  %v607_v63 = vld [vmem:[#allocation5 + $0x940] sm:$0xff]  ;;  %v1991_v0 = vpack.c.bf16 %v610_v57, %v608_v56  ;;  %v609_v1 = vld [vmem:[#allocation5 + $0x950] sm:$0xff]  ;;  %v356_v2 = vld [vmem:[#allocation5 + $0x168] sm:$0xff]  ;;  %v1737_v6 = vpack.c.bf16 %v353_v62, %v351_v61 }
  0xba   : > { %1978 = vmatpush1.bf16.msra.mxu0 %v1977_v23  ;;  %1724 = vmatprep.subr.bf16.mxu1 %v1723_v24  ;;  %v358_v3 = vld [vmem:[#allocation5 + $0x178] sm:$0xff]  ;;  %v612_v4 = vld [vmem:[#allocation5 + $0x968] sm:$0xff]  ;;  %v355_v7 = vld [vmem:[#allocation5 + $0x160] sm:$0xff]  ;;  %v1993_v8 = vpack.c.bf16 %v609_v1, %v607_v63 }
  0xbb   : > { %1980 = vmatprep.subr.bf16.mxu0 %v1979_v28  ;;  %v614_v5 = vld [vmem:[#allocation5 + $0x978] sm:$0xff]  ;;  %v1739_v9 = vpack.c.bf16 %v358_v3, %v356_v2  ;;  %v357_v10 = vld [vmem:[#allocation5 + $0x170] sm:$0xff]  ;;  %v611_v11 = vld [vmem:[#allocation5 + $0x960] sm:$0xff] }
  0xbc   : > { %v613_v12 = vld [vmem:[#allocation5 + $0x970] sm:$0xff]  ;;  %v1995_v13 = vpack.c.bf16 %v614_v5, %v612_v4  ;;  %v360_v14 = vld [vmem:[#allocation5 + $0x188] sm:$0xff]  ;;  %v362_v15 = vld [vmem:[#allocation5 + $0x198] sm:$0xff]  ;;  %v1741_v20 = vpack.c.bf16 %v357_v10, %v355_v7 }
  0xbd   : > { %1726 = vmatpush1.bf16.msra.mxu1 %v1725_v34  ;;  %v296_v16 = vld [vmem:[%s2819_s14 + $0x8] sm:$0xff]  ;;  %v618_v18 = vld [vmem:[#allocation5 + $0x998] sm:$0xff]  ;;  %v1997_v21 = vpack.c.bf16 %v613_v12, %v611_v11  ;;  %v1743_v22 = vpack.c.bf16 %v362_v15, %v360_v14  ;;  %v359_v23 = vld [vmem:[#allocation5 + $0x180] sm:$0xff] }
  0xbe   : > { %1982 = vmatpush1.bf16.msra.mxu0 %v1981_v35  ;;  %1728 = vmatprep.subr.bf16.mxu1 %v1727_v36  ;;  %v616_v17 = vld [vmem:[#allocation5 + $0x988] sm:$0xff]  ;;  %v361_v24 = vld [vmem:[#allocation5 + $0x190] sm:$0xff]  ;;  %v615_v25 = vld [vmem:[#allocation5 + $0x980] sm:$0xff] }
  0xbf   : > { %1984 = vmatprep.subr.bf16.mxu0 %v1983_v40  ;;  %899 = vmatprep.mubr.f32.mxu1 %v296_v16  ;;  %v304_v19 = vld [vmem:[%s2819_s14 + $0x48] sm:$0xff]  ;;  %v1999_v26 = vpack.c.bf16 %v618_v18, %v616_v17  ;;  %v617_v27 = vld [vmem:[#allocation5 + $0x990] sm:$0xff]  ;;  %v366_v29 = vld [vmem:[#allocation5 + $0x1b8] sm:$0xff]  ;;  %v1745_v32 = vpack.c.bf16 %v361_v24, %v359_v23 }
  0xc0   : > { %1183 = vmatprep.mubr.f32.mxu0 %v304_v19  ;;  %v364_v28 = vld [vmem:[#allocation5 + $0x1a8] sm:$0xff]  ;;  %v622_v31 = vld [vmem:[#allocation5 + $0x9b8] sm:$0xff]  ;;  %v2001_v33 = vpack.c.bf16 %v617_v27, %v615_v25  ;;  %v363_v35 = vld [vmem:[#allocation5 + $0x1a0] sm:$0xff] }
  0xc1   : > { %1730 = vmatpush1.bf16.msra.mxu1 %v1729_v46  ;;  %v620_v30 = vld [vmem:[#allocation5 + $0x9a8] sm:$0xff]  ;;  %v1747_v34 = vpack.c.bf16 %v366_v29, %v364_v28  ;;  %v365_v36 = vld [vmem:[#allocation5 + $0x1b0] sm:$0xff]  ;;  %v619_v37 = vld [vmem:[#allocation5 + $0x9a0] sm:$0xff] }
  0xc2   : > { %1986 = vmatpush1.bf16.msra.mxu0 %v1985_v47  ;;  %1732 = vmatprep.subr.bf16.mxu1 %v1731_v48  ;;  %v2003_v38 = vpack.c.bf16 %v622_v31, %v620_v30  ;;  %v621_v39 = vld [vmem:[#allocation5 + $0x9b0] sm:$0xff]  ;;  %v368_v40 = vld [vmem:[#allocation5 + $0x1c8] sm:$0xff]  ;;  %v370_v41 = vld [vmem:[#allocation5 + $0x1d8] sm:$0xff]  ;;  %v1749_v44 = vpack.c.bf16 %v365_v36, %v363_v35 }
  0xc3   : > { %1988 = vmatprep.subr.bf16.mxu0 %v1987_v52  ;;  %v624_v42 = vld [vmem:[#allocation5 + $0x9c8] sm:$0xff]  ;;  %v626_v43 = vld [vmem:[#allocation5 + $0x9d8] sm:$0xff]  ;;  %v2005_v45 = vpack.c.bf16 %v621_v39, %v619_v37  ;;  %v1751_v46 = vpack.c.bf16 %v370_v41, %v368_v40  ;;  %v367_v47 = vld [vmem:[#allocation5 + $0x1c0] sm:$0xff] }
  0xc4   : > { %v369_v48 = vld [vmem:[#allocation5 + $0x1d0] sm:$0xff]  ;;  %v623_v49 = vld [vmem:[#allocation5 + $0x9c0] sm:$0xff]  ;;  %v2007_v50 = vpack.c.bf16 %v626_v43, %v624_v42  ;;  %v372_v52 = vld [vmem:[#allocation5 + $0x1e8] sm:$0xff] }
  0xc5   : > { %1734 = vmatpush1.bf16.msra.mxu1 %v1733_v58  ;;  %v625_v51 = vld [vmem:[#allocation5 + $0x9d0] sm:$0xff]  ;;  %v374_v53 = vld [vmem:[#allocation5 + $0x1f8] sm:$0xff]  ;;  %v628_v54 = vld [vmem:[#allocation5 + $0x9e8] sm:$0xff]  ;;  %v1753_v56 = vpack.c.bf16 %v369_v48, %v367_v47 }
  0xc6   : > { %1990 = vmatpush1.bf16.msra.mxu0 %v1989_v59  ;;  %1736 = vmatprep.subr.bf16.mxu1 %v1735_v60  ;;  %v630_v55 = vld [vmem:[#allocation5 + $0x9f8] sm:$0xff]  ;;  %v2009_v57 = vpack.c.bf16 %v625_v51, %v623_v49  ;;  %v1755_v58 = vpack.c.bf16 %v374_v53, %v372_v52  ;;  %v371_v59 = vld [vmem:[#allocation5 + $0x1e0] sm:$0xff]  ;;  %v373_v60 = vld [vmem:[#allocation5 + $0x1f0] sm:$0xff] }
  0xc7   : > { %1992 = vmatprep.subr.bf16.mxu0 %v1991_v0  ;;  %v627_v61 = vld [vmem:[#allocation5 + $0x9e0] sm:$0xff]  ;;  %v2011_v62 = vpack.c.bf16 %v630_v55, %v628_v54  ;;  %v629_v63 = vld [vmem:[#allocation5 + $0x9f0] sm:$0xff]  ;;  %v376_v0 = vld [vmem:[#allocation5 + $0x208] sm:$0xff]  ;;  %v1757_v4 = vpack.c.bf16 %v373_v60, %v371_v59 }
  0xc8   : > { %v378_v1 = vld [vmem:[#allocation5 + $0x218] sm:$0xff]  ;;  %v632_v2 = vld [vmem:[#allocation5 + $0xa08] sm:$0xff]  ;;  %v2013_v5 = vpack.c.bf16 %v629_v63, %v627_v61  ;;  %v375_v7 = vld [vmem:[#allocation5 + $0x200] sm:$0xff] }
  0xc9   : > { %1738 = vmatpush1.bf16.msra.mxu1 %v1737_v6  ;;  %v634_v3 = vld [vmem:[#allocation5 + $0xa18] sm:$0xff]  ;;  %v1759_v6 = vpack.c.bf16 %v378_v1, %v376_v0  ;;  %v633_v11 = vld [vmem:[#allocation5 + $0xa10] sm:$0xff]  ;;  %v380_v12 = vld [vmem:[#allocation5 + $0x228] sm:$0xff] }
  0xca   : > { %1994 = vmatpush1.bf16.msra.mxu0 %v1993_v8  ;;  %1740 = vmatprep.subr.bf16.mxu1 %v1739_v9  ;;  %v377_v8 = vld [vmem:[#allocation5 + $0x210] sm:$0xff]  ;;  %v631_v9 = vld [vmem:[#allocation5 + $0xa00] sm:$0xff]  ;;  %v2015_v10 = vpack.c.bf16 %v634_v3, %v632_v2  ;;  %v636_v14 = vld [vmem:[#allocation5 + $0xa28] sm:$0xff] }
  0xcb   : > { %1996 = vmatprep.subr.bf16.mxu0 %v1995_v13  ;;  %v382_v13 = vld [vmem:[#allocation5 + $0x238] sm:$0xff]  ;;  %v295_v16 = vld [vmem:[%s2819_s14] sm:$0xff]  ;;  %v1761_v17 = vpack.c.bf16 %v377_v8, %v375_v7  ;;  %v2017_v19 = vpack.c.bf16 %v633_v11, %v631_v9  ;;  %v637_v25 = vld [vmem:[#allocation5 + $0xa30] sm:$0xff] }
  0xcc   : > { %v638_v15 = vld [vmem:[#allocation5 + $0xa38] sm:$0xff]  ;;  %v303_v18 = vld [vmem:[%s2819_s14 + $0x40] sm:$0xff]  ;;  %v640_v28 = vld [vmem:[#allocation5 + $0xa48] sm:$0xff] }
  0xcd   : > { %1742 = vmatpush1.bf16.msra.mxu1 %v1741_v20  ;;  %v1763_v20 = vpack.c.bf16 %v382_v13, %v380_v12  ;;  %v635_v23 = vld [vmem:[#allocation5 + $0xa20] sm:$0xff]  ;;  %v2019_v24 = vpack.c.bf16 %v638_v15, %v636_v14  ;;  %v386_v27 = vld [vmem:[#allocation5 + $0x258] sm:$0xff]  ;;  %v641_v37 = vld [vmem:[#allocation5 + $0xa50] sm:$0xff] }
  0xce   : > { %1998 = vmatpush1.bf16.msra.mxu0 %v1997_v21  ;;  %1744 = vmatprep.subr.bf16.mxu1 %v1743_v22  ;;  %v379_v21 = vld [vmem:[#allocation5 + $0x220] sm:$0xff]  ;;  %v381_v22 = vld [vmem:[#allocation5 + $0x230] sm:$0xff]  ;;  %v642_v29 = vld [vmem:[#allocation5 + $0xa58] sm:$0xff]  ;;  %v2021_v31 = vpack.c.bf16 %v637_v25, %v635_v23 }
  0xcf   : > { %2000 = vmatprep.subr.bf16.mxu0 %v1999_v26  ;;  %v384_v26 = vld [vmem:[#allocation5 + $0x248] sm:$0xff]  ;;  %v1765_v30 = vpack.c.bf16 %v381_v22, %v379_v21  ;;  %v639_v35 = vld [vmem:[#allocation5 + $0xa40] sm:$0xff]  ;;  %v2023_v36 = vpack.c.bf16 %v642_v29, %v640_v28  ;;  %v390_v39 = vld [vmem:[#allocation5 + $0x278] sm:$0xff] }
  0xd0   : > { %v644_v40 = vld [vmem:[#allocation5 + $0xa68] sm:$0xff]  ;;  %v646_v41 = vld [vmem:[#allocation5 + $0xa78] sm:$0xff]  ;;  %v2025_v43 = vpack.c.bf16 %v641_v37, %v639_v35  ;;  %v643_v47 = vld [vmem:[#allocation5 + $0xa60] sm:$0xff] }
  0xd1   : > { %1746 = vmatpush1.bf16.msra.mxu1 %v1745_v32  ;;  %v1767_v32 = vpack.c.bf16 %v386_v27, %v384_v26  ;;  %v2027_v48 = vpack.c.bf16 %v646_v41, %v644_v40  ;;  %v645_v49 = vld [vmem:[#allocation5 + $0xa70] sm:$0xff]  ;;  %v394_v51 = vld [vmem:[#allocation5 + $0x298] sm:$0xff]  ;;  %v648_v52 = vld [vmem:[#allocation5 + $0xa88] sm:$0xff] }
  0xd2   : > { %2002 = vmatpush1.bf16.msra.mxu0 %v2001_v33  ;;  %1748 = vmatprep.subr.bf16.mxu1 %v1747_v34  ;;  %v383_v33 = vld [vmem:[#allocation5 + $0x240] sm:$0xff]  ;;  %v385_v34 = vld [vmem:[#allocation5 + $0x250] sm:$0xff]  ;;  %v650_v53 = vld [vmem:[#allocation5 + $0xa98] sm:$0xff]  ;;  %v2029_v55 = vpack.c.bf16 %v645_v49, %v643_v47 }
  0xd3   : > { %2004 = vmatprep.subr.bf16.mxu0 %v2003_v38  ;;  %v388_v38 = vld [vmem:[#allocation5 + $0x268] sm:$0xff]  ;;  %v1769_v42 = vpack.c.bf16 %v385_v34, %v383_v33  ;;  %v647_v59 = vld [vmem:[#allocation5 + $0xa80] sm:$0xff]  ;;  %v2031_v60 = vpack.c.bf16 %v650_v53, %v648_v52  ;;  %v649_v61 = vld [vmem:[#allocation5 + $0xa90] sm:$0xff] }
  0xd4   : > { %v398_v63 = vld [vmem:[#allocation5 + $0x2b8] sm:$0xff]  ;;  %v652_v0 = vld [vmem:[#allocation5 + $0xaa8] sm:$0xff]  ;;  %v2033_v3 = vpack.c.bf16 %v649_v61, %v647_v59  ;;  %v651_v7 = vld [vmem:[#allocation5 + $0xaa0] sm:$0xff] }
  0xd5   : > { %1750 = vmatpush1.bf16.msra.mxu1 %v1749_v44  ;;  %v1771_v44 = vpack.c.bf16 %v390_v39, %v388_v38  ;;  %v654_v1 = vld [vmem:[#allocation5 + $0xab8] sm:$0xff]  ;;  %v653_v9 = vld [vmem:[#allocation5 + $0xab0] sm:$0xff]  ;;  %v656_v12 = vld [vmem:[#allocation5 + $0xac8] sm:$0xff] }
  0xd6   : > { %2006 = vmatpush1.bf16.msra.mxu0 %v2005_v45  ;;  %1752 = vmatprep.subr.bf16.mxu1 %v1751_v46  ;;  %v387_v45 = vld [vmem:[#allocation5 + $0x260] sm:$0xff]  ;;  %v389_v46 = vld [vmem:[#allocation5 + $0x270] sm:$0xff]  ;;  %v2035_v8 = vpack.c.bf16 %v654_v1, %v652_v0  ;;  %v402_v11 = vld [vmem:[#allocation5 + $0x2d8] sm:$0xff] }
  0xd7   : > { %2008 = vmatprep.subr.bf16.mxu0 %v2007_v50  ;;  %v392_v50 = vld [vmem:[#allocation5 + $0x288] sm:$0xff]  ;;  %v1773_v54 = vpack.c.bf16 %v389_v46, %v387_v45  ;;  %v658_v13 = vld [vmem:[#allocation5 + $0xad8] sm:$0xff]  ;;  %v399_v15 = vld [vmem:[#allocation5 + $0x2c0] sm:$0xff] }
  0xd8   : > { %v2039_v21 = vpack.c.bf16 %v658_v13, %v656_v12  ;;  %v404_v22 = vld [vmem:[#allocation5 + $0x2e8] sm:$0xff]  ;;  %v406_v23 = vld [vmem:[#allocation5 + $0x2f8] sm:$0xff]  ;;  %v659_v33 = vld [vmem:[#allocation5 + $0xae0] sm:$0xff] }
  0xd9   : > { %1754 = vmatpush1.bf16.msra.mxu1 %v1753_v56  ;;  %v1775_v56 = vpack.c.bf16 %v394_v51, %v392_v50  ;;  %v660_v25 = vld [vmem:[#allocation5 + $0xae8] sm:$0xff]  ;;  %v662_v26 = vld [vmem:[#allocation5 + $0xaf8] sm:$0xff]  ;;  %v661_v35 = vld [vmem:[#allocation5 + $0xaf0] sm:$0xff] }
  0xda   : > { %2010 = vmatpush1.bf16.msra.mxu0 %v2009_v57  ;;  %1756 = vmatprep.subr.bf16.mxu1 %v1755_v58  ;;  %v391_v57 = vld [vmem:[#allocation5 + $0x280] sm:$0xff]  ;;  %v393_v58 = vld [vmem:[#allocation5 + $0x290] sm:$0xff]  ;;  %v306_v27 = vld [vmem:[%s2819_s14 + $0x58] sm:$0xff]  ;;  %v2043_v34 = vpack.c.bf16 %v662_v26, %v660_v25  ;;  %v2045_v41 = vpack.c.bf16 %v661_v35, %v659_v33 }
  0xdb   : > { %2012 = vmatprep.subr.bf16.mxu0 %v2011_v62  ;;  %v396_v62 = vld [vmem:[#allocation5 + $0x2a8] sm:$0xff]  ;;  %v1777_v2 = vpack.c.bf16 %v393_v58, %v391_v57  ;;  %v410_v37 = vld [vmem:[#allocation5 + $0x318] sm:$0xff]  ;;  %v663_v45 = vld [vmem:[#allocation5 + $0xb00] sm:$0xff] }
  0xdc   : > { %v664_v38 = vld [vmem:[#allocation5 + $0xb08] sm:$0xff]  ;;  %v666_v39 = vld [vmem:[#allocation5 + $0xb18] sm:$0xff]  ;;  %v665_v47 = vld [vmem:[#allocation5 + $0xb10] sm:$0xff] }
  0xdd   : > { %1758 = vmatpush1.bf16.msra.mxu1 %v1757_v4  ;;  %v1779_v4 = vpack.c.bf16 %v398_v63, %v396_v62  ;;  %v2047_v46 = vpack.c.bf16 %v666_v39, %v664_v38  ;;  %v414_v49 = vld [vmem:[#allocation5 + $0x338] sm:$0xff]  ;;  %v668_v50 = vld [vmem:[#allocation5 + $0xb28] sm:$0xff]  ;;  %v2049_v53 = vpack.c.bf16 %v665_v47, %v663_v45  ;;  %v667_v57 = vld [vmem:[#allocation5 + $0xb20] sm:$0xff] }
  0xde   : > { %2014 = vmatpush1.bf16.msra.mxu0 %v2013_v5  ;;  %1760 = vmatprep.subr.bf16.mxu1 %v1759_v6  ;;  %v395_v5 = vld [vmem:[#allocation5 + $0x2a0] sm:$0xff]  ;;  %v397_v6 = vld [vmem:[#allocation5 + $0x2b0] sm:$0xff]  ;;  %v670_v51 = vld [vmem:[#allocation5 + $0xb38] sm:$0xff] }
  0xdf   : > { %2016 = vmatprep.subr.bf16.mxu0 %v2015_v10  ;;  %v400_v10 = vld [vmem:[#allocation5 + $0x2c8] sm:$0xff]  ;;  %v1781_v14 = vpack.c.bf16 %v397_v6, %v395_v5  ;;  %v2051_v58 = vpack.c.bf16 %v670_v51, %v668_v50  ;;  %v669_v59 = vld [vmem:[#allocation5 + $0xb30] sm:$0xff]  ;;  %v418_v61 = vld [vmem:[#allocation5 + $0x358] sm:$0xff] }
  0xe0   : > { %900 = vmatmul.mubr.f32.vlgmr.msra.gmra.mrb[0].mxu1 %v295_v16  ;;  %v2037_v16 = vpack.c.bf16 %v653_v9, %v651_v7  ;;  %v672_v62 = vld [vmem:[#allocation5 + $0xb48] sm:$0xff]  ;;  %v674_v63 = vld [vmem:[#allocation5 + $0xb58] sm:$0xff]  ;;  %v2053_v1 = vpack.c.bf16 %v669_v59, %v667_v57  ;;  %v671_v5 = vld [vmem:[#allocation5 + $0xb40] sm:$0xff] }
  0xe1   : > { %1762 = vmatpush1.bf16.msra.mxu1 %v1761_v17  ;;  %1184 = vmatmul.mubr.f32.vlgmr.msra.gmra.mrb[0].mxu0 %v303_v18  ;;  %v1783_v17 = vpack.c.bf16 %v402_v11, %v400_v10  ;;  %v401_v18 = vld [vmem:[#allocation5 + $0x2d0] sm:$0xff]  ;;  %v2055_v6 = vpack.c.bf16 %v674_v63, %v672_v62  ;;  %v422_v9 = vld [vmem:[#allocation5 + $0x378] sm:$0xff]  ;;  %v676_v10 = vld [vmem:[#allocation5 + $0xb68] sm:$0xff] }
  0xe2   : > { %2018 = vmatpush1.bf16.msra.mxu0 %v2017_v19  ;;  %1764 = vmatprep.subr.bf16.mxu1 %v1763_v20  ;;  %v655_v19 = vld [vmem:[#allocation5 + $0xac0] sm:$0xff]  ;;  %v657_v20 = vld [vmem:[#allocation5 + $0xad0] sm:$0xff]  ;;  %v1785_v28 = vpack.c.bf16 %v401_v18, %v399_v15  ;;  %v678_v11 = vld [vmem:[#allocation5 + $0xb78] sm:$0xff] }
  0xe3   : > { %2020 = vmatprep.subr.bf16.mxu0 %v2019_v24  ;;  %v298_v24 = vld [vmem:[%s2819_s14 + $0x18] sm:$0xff]  ;;  %1254 = vmatprep.mubr.f32.mxu0 %v306_v27  ;;  %v2041_v29 = vpack.c.bf16 %v657_v20, %v655_v19  ;;  %v673_v7 = vld [vmem:[#allocation5 + $0xb50] sm:$0xff]  ;;  %v419_v15 = vld [vmem:[#allocation5 + $0x360] sm:$0xff]  ;;  %v2059_v18 = vpack.c.bf16 %v678_v11, %v676_v10 }
  0xe4   : > { %970 = vmatprep.mubr.f32.mxu1 %v298_v24  ;;  %v2057_v13 = vpack.c.bf16 %v673_v7, %v671_v5  ;;  %v677_v19 = vld [vmem:[#allocation5 + $0xb70] sm:$0xff]  ;;  %v424_v20 = vld [vmem:[#allocation5 + $0x388] sm:$0xff]  ;;  %v423_v27 = vld [vmem:[#allocation5 + $0x380] sm:$0xff] }
  0xe5   : > { %1766 = vmatpush1.bf16.msra.mxu1 %v1765_v30  ;;  %v1787_v30 = vpack.c.bf16 %v406_v23, %v404_v22  ;;  %v680_v22 = vld [vmem:[#allocation5 + $0xb88] sm:$0xff]  ;;  %v682_v23 = vld [vmem:[#allocation5 + $0xb98] sm:$0xff]  ;;  %v427_v39 = vld [vmem:[#allocation5 + $0x3a0] sm:$0xff] }
  0xe6   : > { %2022 = vmatpush1.bf16.msra.mxu0 %v2021_v31  ;;  %1768 = vmatprep.subr.bf16.mxu1 %v1767_v32  ;;  %v403_v31 = vld [vmem:[#allocation5 + $0x2e0] sm:$0xff]  ;;  %v405_v32 = vld [vmem:[#allocation5 + $0x2f0] sm:$0xff]  ;;  %v430_v33 = vld [vmem:[#allocation5 + $0x3b8] sm:$0xff] }
  0xe7   : > { %2024 = vmatprep.subr.bf16.mxu0 %v2023_v36  ;;  %v408_v36 = vld [vmem:[#allocation5 + $0x308] sm:$0xff]  ;;  %v1789_v40 = vpack.c.bf16 %v405_v32, %v403_v31  ;;  %v681_v31 = vld [vmem:[#allocation5 + $0xb90] sm:$0xff]  ;;  %v686_v35 = vld [vmem:[#allocation5 + $0xbb8] sm:$0xff] }
  0xe8   : > { %v428_v32 = vld [vmem:[#allocation5 + $0x3a8] sm:$0xff]  ;;  %v434_v45 = vld [vmem:[#allocation5 + $0x3d8] sm:$0xff]  ;;  %v431_v51 = vld [vmem:[#allocation5 + $0x3c0] sm:$0xff] }
  0xe9   : > { %1770 = vmatpush1.bf16.msra.mxu1 %v1769_v42  ;;  %v1791_v42 = vpack.c.bf16 %v410_v37, %v408_v36  ;;  %v1811_v38 = vpack.c.bf16 %v430_v33, %v428_v32  ;;  %v690_v47 = vld [vmem:[#allocation5 + $0xbd8] sm:$0xff]  ;;  %v435_v63 = vld [vmem:[#allocation5 + $0x3e0] sm:$0xff]  ;;  %v704_v32 = vld [vmem:[#allocation5 + $0xc48] sm:$0xff] }
  0xea   : > { %2026 = vmatpush1.bf16.msra.mxu0 %v2025_v43  ;;  %1772 = vmatprep.subr.bf16.mxu1 %v1771_v44  ;;  %v407_v43 = vld [vmem:[#allocation5 + $0x300] sm:$0xff]  ;;  %v409_v44 = vld [vmem:[#allocation5 + $0x310] sm:$0xff]  ;;  %v438_v57 = vld [vmem:[#allocation5 + $0x3f8] sm:$0xff] }
  0xeb   : > { %2028 = vmatprep.subr.bf16.mxu0 %v2027_v48  ;;  %v412_v48 = vld [vmem:[#allocation5 + $0x328] sm:$0xff]  ;;  %v1793_v52 = vpack.c.bf16 %v409_v44, %v407_v43  ;;  %v685_v43 = vld [vmem:[#allocation5 + $0xbb0] sm:$0xff]  ;;  %v694_v59 = vld [vmem:[#allocation5 + $0xbf8] sm:$0xff] }
  0xec   : > { %v432_v44 = vld [vmem:[#allocation5 + $0x3c8] sm:$0xff]  ;;  %v442_v5 = vld [vmem:[#allocation5 + $0x418] sm:$0xff]  ;;  %v439_v11 = vld [vmem:[#allocation5 + $0x400] sm:$0xff] }
  0xed   : > { %1774 = vmatpush1.bf16.msra.mxu1 %v1773_v54  ;;  %v1795_v54 = vpack.c.bf16 %v414_v49, %v412_v48  ;;  %v1815_v50 = vpack.c.bf16 %v434_v45, %v432_v44  ;;  %v698_v7 = vld [vmem:[#allocation5 + $0xc18] sm:$0xff]  ;;  %v452_v44 = vld [vmem:[#allocation5 + $0x468] sm:$0xff] }
  0xee   : > { %2030 = vmatpush1.bf16.msra.mxu0 %v2029_v55  ;;  %1776 = vmatprep.subr.bf16.mxu1 %v1775_v56  ;;  %v411_v55 = vld [vmem:[#allocation5 + $0x320] sm:$0xff]  ;;  %v413_v56 = vld [vmem:[#allocation5 + $0x330] sm:$0xff]  ;;  %v706_v33 = vld [vmem:[#allocation5 + $0xc58] sm:$0xff] }
  0xef   : > { %2032 = vmatprep.subr.bf16.mxu0 %v2031_v60  ;;  %v416_v60 = vld [vmem:[#allocation5 + $0x348] sm:$0xff]  ;;  %v1797_v0 = vpack.c.bf16 %v413_v56, %v411_v55  ;;  %v689_v55 = vld [vmem:[#allocation5 + $0xbd0] sm:$0xff]  ;;  %v454_v45 = vld [vmem:[#allocation5 + $0x478] sm:$0xff] }
  0xf0   : > { %v436_v56 = vld [vmem:[#allocation5 + $0x3e8] sm:$0xff] }
  0xf1   : > { %1778 = vmatpush1.bf16.msra.mxu1 %v1777_v2  ;;  %v1799_v2 = vpack.c.bf16 %v418_v61, %v416_v60  ;;  %v1819_v62 = vpack.c.bf16 %v438_v57, %v436_v56  ;;  %v456_v56 = vld [vmem:[#allocation5 + $0x488] sm:$0xff]  ;;  %v458_v57 = vld [vmem:[#allocation5 + $0x498] sm:$0xff] }
  0xf2   : > { %2034 = vmatpush1.bf16.msra.mxu0 %v2033_v3  ;;  %1780 = vmatprep.subr.bf16.mxu1 %v1779_v4  ;;  %v415_v3 = vld [vmem:[#allocation5 + $0x340] sm:$0xff]  ;;  %v417_v4 = vld [vmem:[#allocation5 + $0x350] sm:$0xff] }
  0xf3   : > { %2036 = vmatprep.subr.bf16.mxu0 %v2035_v8  ;;  %v420_v8 = vld [vmem:[#allocation5 + $0x368] sm:$0xff]  ;;  %v1801_v12 = vpack.c.bf16 %v417_v4, %v415_v3  ;;  %v693_v3 = vld [vmem:[#allocation5 + $0xbf0] sm:$0xff] }
  0xf4   : > { %v440_v4 = vld [vmem:[#allocation5 + $0x408] sm:$0xff] }
  0xf5   : > { %1782 = vmatpush1.bf16.msra.mxu1 %v1781_v14  ;;  %v1803_v14 = vpack.c.bf16 %v422_v9, %v420_v8  ;;  %v1823_v10 = vpack.c.bf16 %v442_v5, %v440_v4  ;;  %v460_v4 = vld [vmem:[#allocation5 + $0x4a8] sm:$0xff]  ;;  %v462_v5 = vld [vmem:[#allocation5 + $0x4b8] sm:$0xff] }
  0xf6   : > { %2038 = vmatpush1.bf16.msra.mxu0 %v2037_v16  ;;  %1784 = vmatprep.subr.bf16.mxu1 %v1783_v17  ;;  %v421_v16 = vld [vmem:[#allocation5 + $0x370] sm:$0xff]  ;;  %v675_v17 = vld [vmem:[#allocation5 + $0xb60] sm:$0xff] }
  0xf7   : > { %2040 = vmatprep.subr.bf16.mxu0 %v2039_v21  ;;  %v426_v21 = vld [vmem:[#allocation5 + $0x398] sm:$0xff]  ;;  %v1805_v24 = vpack.c.bf16 %v421_v16, %v419_v15  ;;  %v2061_v25 = vpack.c.bf16 %v677_v19, %v675_v17  ;;  %v697_v15 = vld [vmem:[#allocation5 + $0xc10] sm:$0xff]  ;;  %v444_v16 = vld [vmem:[#allocation5 + $0x428] sm:$0xff] }
  0xf8   : > { %v1807_v26 = vpack.c.bf16 %v426_v21, %v424_v20  ;;  %v446_v17 = vld [vmem:[#allocation5 + $0x438] sm:$0xff]  ;;  %v297_v20 = vld [vmem:[%s2819_s14 + $0x10] sm:$0xff] }
  0xf9   : > { %1786 = vmatpush1.bf16.msra.mxu1 %v1785_v28  ;;  %v425_v28 = vld [vmem:[#allocation5 + $0x390] sm:$0xff]  ;;  %v702_v19 = vld [vmem:[#allocation5 + $0xc38] sm:$0xff] }
  0xfa   : > { %2042 = vmatpush1.bf16.msra.mxu0 %v2041_v29  ;;  %1788 = vmatprep.subr.bf16.mxu1 %v1787_v30  ;;  %v679_v29 = vld [vmem:[#allocation5 + $0xb80] sm:$0xff]  ;;  %v2063_v30 = vpack.c.bf16 %v682_v23, %v680_v22  ;;  %v1809_v36 = vpack.c.bf16 %v425_v28, %v423_v27  ;;  %v305_v22 = vld [vmem:[%s2819_s14 + $0x50] sm:$0xff] }
  0xfb   : > { %2044 = vmatprep.subr.bf16.mxu0 %v2043_v34  ;;  %v684_v34 = vld [vmem:[#allocation5 + $0xba8] sm:$0xff]  ;;  %v2065_v37 = vpack.c.bf16 %v681_v31, %v679_v29  ;;  %v699_v27 = vld [vmem:[#allocation5 + $0xc20] sm:$0xff]  ;;  %v701_v29 = vld [vmem:[#allocation5 + $0xc30] sm:$0xff] }
  0xfc   : > { %v450_v31 = vld [vmem:[#allocation5 + $0x458] sm:$0xff] }
  0xfd   : > { %1790 = vmatpush1.bf16.msra.mxu1 %v1789_v40  ;;  %v429_v40 = vld [vmem:[#allocation5 + $0x3b0] sm:$0xff] }
  0xfe   : > { %2046 = vmatpush1.bf16.msra.mxu0 %v2045_v41  ;;  %1792 = vmatprep.subr.bf16.mxu1 %v1791_v42  ;;  %v683_v41 = vld [vmem:[#allocation5 + $0xba0] sm:$0xff]  ;;  %v2067_v42 = vpack.c.bf16 %v686_v35, %v684_v34  ;;  %v1813_v48 = vpack.c.bf16 %v429_v40, %v427_v39  ;;  %v300_v34 = vld [vmem:[%s2819_s14 + $0x28] sm:$0xff]  ;;  %v449_v40 = vld [vmem:[#allocation5 + $0x450] sm:$0xff] }
  0xff   : > { %2048 = vmatprep.subr.bf16.mxu0 %v2047_v46  ;;  %v688_v46 = vld [vmem:[#allocation5 + $0xbc8] sm:$0xff]  ;;  %v2069_v49 = vpack.c.bf16 %v685_v43, %v683_v41  ;;  %v447_v39 = vld [vmem:[#allocation5 + $0x440] sm:$0xff]  ;;  %v705_v43 = vld [vmem:[#allocation5 + $0xc50] sm:$0xff] }
 0x100   : > { %v703_v41 = vld [vmem:[#allocation5 + $0xc40] sm:$0xff] }
 0x101   : > { %1794 = vmatpush1.bf16.msra.mxu1 %v1793_v52  ;;  %v433_v52 = vld [vmem:[#allocation5 + $0x3d0] sm:$0xff] }
 0x102   : > { %2050 = vmatpush1.bf16.msra.mxu0 %v2049_v53  ;;  %1796 = vmatprep.subr.bf16.mxu1 %v1795_v54  ;;  %v687_v53 = vld [vmem:[#allocation5 + $0xbc0] sm:$0xff]  ;;  %v2071_v54 = vpack.c.bf16 %v690_v47, %v688_v46  ;;  %v1817_v60 = vpack.c.bf16 %v433_v52, %v431_v51  ;;  %v708_v46 = vld [vmem:[#allocation5 + $0xc68] sm:$0xff]  ;;  %v710_v47 = vld [vmem:[#allocation5 + $0xc78] sm:$0xff] }
 0x103   : > { %2052 = vmatprep.subr.bf16.mxu0 %v2051_v58  ;;  %v692_v58 = vld [vmem:[#allocation5 + $0xbe8] sm:$0xff]  ;;  %v2073_v61 = vpack.c.bf16 %v689_v55, %v687_v53  ;;  %v451_v51 = vld [vmem:[#allocation5 + $0x460] sm:$0xff]  ;;  %v453_v52 = vld [vmem:[#allocation5 + $0x470] sm:$0xff] }
 0x104   : > { %v707_v53 = vld [vmem:[#allocation5 + $0xc60] sm:$0xff]  ;;  %v709_v55 = vld [vmem:[#allocation5 + $0xc70] sm:$0xff] }
 0x105   : > { %1798 = vmatpush1.bf16.msra.mxu1 %v1797_v0  ;;  %v437_v0 = vld [vmem:[#allocation5 + $0x3f0] sm:$0xff] }
 0x106   : > { %2054 = vmatpush1.bf16.msra.mxu0 %v2053_v1  ;;  %1800 = vmatprep.subr.bf16.mxu1 %v1799_v2  ;;  %v691_v1 = vld [vmem:[#allocation5 + $0xbe0] sm:$0xff]  ;;  %v2075_v2 = vpack.c.bf16 %v694_v59, %v692_v58  ;;  %v1821_v8 = vpack.c.bf16 %v437_v0, %v435_v63  ;;  %v712_v58 = vld [vmem:[#allocation5 + $0xc88] sm:$0xff]  ;;  %v714_v59 = vld [vmem:[#allocation5 + $0xc98] sm:$0xff] }
 0x107   : > { %2056 = vmatprep.subr.bf16.mxu0 %v2055_v6  ;;  %v696_v6 = vld [vmem:[#allocation5 + $0xc08] sm:$0xff]  ;;  %v2077_v9 = vpack.c.bf16 %v693_v3, %v691_v1  ;;  %v455_v63 = vld [vmem:[#allocation5 + $0x480] sm:$0xff]  ;;  %v457_v0 = vld [vmem:[#allocation5 + $0x490] sm:$0xff] }
 0x108   : > { %v711_v1 = vld [vmem:[#allocation5 + $0xc80] sm:$0xff]  ;;  %v713_v3 = vld [vmem:[#allocation5 + $0xc90] sm:$0xff] }
 0x109   : > { %1802 = vmatpush1.bf16.msra.mxu1 %v1801_v12  ;;  %v441_v12 = vld [vmem:[#allocation5 + $0x410] sm:$0xff] }
 0x10a   : > { %2058 = vmatpush1.bf16.msra.mxu0 %v2057_v13  ;;  %1804 = vmatprep.subr.bf16.mxu1 %v1803_v14  ;;  %v695_v13 = vld [vmem:[#allocation5 + $0xc00] sm:$0xff]  ;;  %v2079_v14 = vpack.c.bf16 %v698_v7, %v696_v6  ;;  %v1825_v21 = vpack.c.bf16 %v441_v12, %v439_v11  ;;  %v716_v6 = vld [vmem:[#allocation5 + $0xca8] sm:$0xff]  ;;  %v718_v7 = vld [vmem:[#allocation5 + $0xcb8] sm:$0xff] }
 0x10b   : > { %2060 = vmatprep.subr.bf16.mxu0 %v2059_v18  ;;  %v700_v18 = vld [vmem:[#allocation5 + $0xc28] sm:$0xff]  ;;  %v2081_v23 = vpack.c.bf16 %v697_v15, %v695_v13  ;;  %v459_v11 = vld [vmem:[#allocation5 + $0x4a0] sm:$0xff]  ;;  %v461_v12 = vld [vmem:[#allocation5 + $0x4b0] sm:$0xff] }
 0x10c   : > { %v2083_v28 = vpack.c.bf16 %v702_v19, %v700_v18  ;;  %v715_v13 = vld [vmem:[#allocation5 + $0xca0] sm:$0xff]  ;;  %v717_v15 = vld [vmem:[#allocation5 + $0xcb0] sm:$0xff]  ;;  %v720_v18 = vld [vmem:[#allocation5 + $0xcc8] sm:$0xff] }
 0x10d   : > { %1806 = vmatpush1.bf16.msra.mxu1 %v1805_v24  ;;  %v1827_v24 = vpack.c.bf16 %v446_v17, %v444_v16  ;;  %v464_v16 = vld [vmem:[#allocation5 + $0x4c8] sm:$0xff]  ;;  %v466_v17 = vld [vmem:[#allocation5 + $0x4d8] sm:$0xff] }
 0x10e   : > { %2062 = vmatpush1.bf16.msra.mxu0 %v2061_v25  ;;  %1808 = vmatprep.subr.bf16.mxu1 %v1807_v26  ;;  %v443_v25 = vld [vmem:[#allocation5 + $0x420] sm:$0xff]  ;;  %v445_v26 = vld [vmem:[#allocation5 + $0x430] sm:$0xff]  ;;  %v722_v19 = vld [vmem:[#allocation5 + $0xcd8] sm:$0xff] }
 0x10f   : > { %2064 = vmatprep.subr.bf16.mxu0 %v2063_v30  ;;  %v448_v30 = vld [vmem:[#allocation5 + $0x448] sm:$0xff]  ;;  %v1829_v35 = vpack.c.bf16 %v445_v26, %v443_v25  ;;  %v719_v25 = vld [vmem:[#allocation5 + $0xcc0] sm:$0xff]  ;;  %v2103_v26 = vpack.c.bf16 %v722_v19, %v720_v18 }
 0x110   : > { %v483_v19 = vld [vmem:[#allocation5 + $0x560] sm:$0xff] }
 0x111   : > { %1810 = vmatpush1.bf16.msra.mxu1 %v1809_v36  ;;  %v308_v36 = vld [vmem:[%s2819_s14 + $0x68] sm:$0xff] }
 0x112   : > { %2066 = vmatpush1.bf16.msra.mxu0 %v2065_v37  ;;  %1812 = vmatprep.subr.bf16.mxu1 %v1811_v38  ;;  %v2085_v37 = vpack.c.bf16 %v701_v29, %v699_v27  ;;  %v1831_v38 = vpack.c.bf16 %v450_v31, %v448_v30  ;;  %v721_v27 = vld [vmem:[#allocation5 + $0xcd0] sm:$0xff]  ;;  %v470_v29 = vld [vmem:[#allocation5 + $0x4f8] sm:$0xff]  ;;  %v724_v30 = vld [vmem:[#allocation5 + $0xce8] sm:$0xff] }
 0x113   : > { %2068 = vmatprep.subr.bf16.mxu0 %v2067_v42  ;;  %v2087_v42 = vpack.c.bf16 %v706_v33, %v704_v32  ;;  %v726_v31 = vld [vmem:[#allocation5 + $0xcf8] sm:$0xff]  ;;  %v2105_v33 = vpack.c.bf16 %v721_v27, %v719_v25 }
 0x114   : > { %v490_v25 = vld [vmem:[#allocation5 + $0x598] sm:$0xff] }
 0x115   : > { %1814 = vmatpush1.bf16.msra.mxu1 %v1813_v48  ;;  %v1833_v48 = vpack.c.bf16 %v449_v40, %v447_v39  ;;  %v725_v39 = vld [vmem:[#allocation5 + $0xcf0] sm:$0xff]  ;;  %v472_v40 = vld [vmem:[#allocation5 + $0x508] sm:$0xff]  ;;  %v746_v27 = vld [vmem:[#allocation5 + $0xd98] sm:$0xff] }
 0x116   : > { %2070 = vmatpush1.bf16.msra.mxu0 %v2069_v49  ;;  %1816 = vmatprep.subr.bf16.mxu1 %v1815_v50  ;;  %v2089_v49 = vpack.c.bf16 %v705_v43, %v703_v41  ;;  %v1835_v50 = vpack.c.bf16 %v454_v45, %v452_v44  ;;  %v474_v41 = vld [vmem:[#allocation5 + $0x518] sm:$0xff] }
 0x117   : > { %2072 = vmatprep.subr.bf16.mxu0 %v2071_v54  ;;  %v2091_v54 = vpack.c.bf16 %v710_v47, %v708_v46  ;;  %v730_v43 = vld [vmem:[#allocation5 + $0xd18] sm:$0xff]  ;;  %v1855_v46 = vpack.c.bf16 %v474_v41, %v472_v40  ;;  %v471_v47 = vld [vmem:[#allocation5 + $0x500] sm:$0xff] }
 0x119   : > { %1818 = vmatpush1.bf16.msra.mxu1 %v1817_v60  ;;  %v1837_v60 = vpack.c.bf16 %v453_v52, %v451_v51  ;;  %v729_v51 = vld [vmem:[#allocation5 + $0xd10] sm:$0xff]  ;;  %v476_v52 = vld [vmem:[#allocation5 + $0x528] sm:$0xff] }
 0x11a   : > { %2074 = vmatpush1.bf16.msra.mxu0 %v2073_v61  ;;  %1820 = vmatprep.subr.bf16.mxu1 %v1819_v62  ;;  %v2093_v61 = vpack.c.bf16 %v709_v55, %v707_v53  ;;  %v1839_v62 = vpack.c.bf16 %v458_v57, %v456_v56  ;;  %v478_v53 = vld [vmem:[#allocation5 + $0x538] sm:$0xff] }
 0x11b   : > { %2076 = vmatprep.subr.bf16.mxu0 %v2075_v2  ;;  %v2095_v2 = vpack.c.bf16 %v714_v59, %v712_v58  ;;  %v734_v55 = vld [vmem:[#allocation5 + $0xd38] sm:$0xff]  ;;  %v1859_v58 = vpack.c.bf16 %v478_v53, %v476_v52  ;;  %v475_v59 = vld [vmem:[#allocation5 + $0x520] sm:$0xff] }
 0x11d   : > { %1822 = vmatpush1.bf16.msra.mxu1 %v1821_v8  ;;  %v1841_v8 = vpack.c.bf16 %v457_v0, %v455_v63  ;;  %v733_v63 = vld [vmem:[#allocation5 + $0xd30] sm:$0xff]  ;;  %v480_v0 = vld [vmem:[#allocation5 + $0x548] sm:$0xff] }
 0x11e   : > { %2078 = vmatpush1.bf16.msra.mxu0 %v2077_v9  ;;  %1824 = vmatprep.subr.bf16.mxu1 %v1823_v10  ;;  %v2097_v9 = vpack.c.bf16 %v713_v3, %v711_v1  ;;  %v1843_v10 = vpack.c.bf16 %v462_v5, %v460_v4  ;;  %v482_v1 = vld [vmem:[#allocation5 + $0x558] sm:$0xff] }
 0x11f   : > { %2080 = vmatprep.subr.bf16.mxu0 %v2079_v14  ;;  %v2099_v14 = vpack.c.bf16 %v718_v7, %v716_v6  ;;  %v738_v3 = vld [vmem:[#allocation5 + $0xd58] sm:$0xff]  ;;  %v1863_v6 = vpack.c.bf16 %v482_v1, %v480_v0  ;;  %v479_v7 = vld [vmem:[#allocation5 + $0x540] sm:$0xff] }
 0x120   : > { %971 = vmatmul.mubr.f32.vlgmr.msra.gmra.mrb[0].mxu1 %v297_v20  ;;  %v1845_v20 = vpack.c.bf16 %v461_v12, %v459_v11  ;;  %v737_v11 = vld [vmem:[#allocation5 + $0xd50] sm:$0xff]  ;;  %v484_v12 = vld [vmem:[#allocation5 + $0x568] sm:$0xff] }
 0x121   : > { %1826 = vmatpush1.bf16.msra.mxu1 %v1825_v21  ;;  %1255 = vmatmul.mubr.f32.vlgmr.msra.gmra.mrb[0].mxu0 %v305_v22  ;;  %v2101_v21 = vpack.c.bf16 %v717_v15, %v715_v13  ;;  %v1847_v22 = vpack.c.bf16 %v466_v17, %v464_v16  ;;  %v486_v13 = vld [vmem:[#allocation5 + $0x578] sm:$0xff] }
 0x122   : > { %2082 = vmatpush1.bf16.msra.mxu0 %v2081_v23  ;;  %1828 = vmatprep.subr.bf16.mxu1 %v1827_v24  ;;  %v463_v23 = vld [vmem:[#allocation5 + $0x4c0] sm:$0xff]  ;;  %v465_v24 = vld [vmem:[#allocation5 + $0x4d0] sm:$0xff]  ;;  %v742_v15 = vld [vmem:[#allocation5 + $0xd78] sm:$0xff]  ;;  %v1867_v18 = vpack.c.bf16 %v486_v13, %v484_v12 }
 0x123   : > { %2084 = vmatprep.subr.bf16.mxu0 %v2083_v28  ;;  %1041 = vmatprep.mubr.f32.mxu1 %v300_v34  ;;  %v468_v28 = vld [vmem:[#allocation5 + $0x4e8] sm:$0xff]  ;;  %v1849_v32 = vpack.c.bf16 %v465_v24, %v463_v23  ;;  %v741_v23 = vld [vmem:[#allocation5 + $0xd70] sm:$0xff] }
 0x124   : > { %1325 = vmatprep.mubr.f32.mxu0 %v308_v36  ;;  %v1851_v34 = vpack.c.bf16 %v470_v29, %v468_v28  ;;  %v469_v36 = vld [vmem:[#allocation5 + $0x4f0] sm:$0xff]  ;;  %v488_v24 = vld [vmem:[#allocation5 + $0x588] sm:$0xff] }
 0x125   : > { %1830 = vmatpush1.bf16.msra.mxu1 %v1829_v35  ;;  %v467_v35 = vld [vmem:[#allocation5 + $0x4e0] sm:$0xff] }
 0x126   : > { %2086 = vmatpush1.bf16.msra.mxu0 %v2085_v37  ;;  %1832 = vmatprep.subr.bf16.mxu1 %v1831_v38  ;;  %v723_v37 = vld [vmem:[#allocation5 + $0xce0] sm:$0xff]  ;;  %v2107_v38 = vpack.c.bf16 %v726_v31, %v724_v30  ;;  %v1853_v44 = vpack.c.bf16 %v469_v36, %v467_v35  ;;  %v1871_v30 = vpack.c.bf16 %v490_v25, %v488_v24  ;;  %v745_v35 = vld [vmem:[#allocation5 + $0xd90] sm:$0xff]  ;;  %v492_v36 = vld [vmem:[#allocation5 + $0x5a8] sm:$0xff] }
 0x127   : > { %2088 = vmatprep.subr.bf16.mxu0 %v2087_v42  ;;  %v728_v42 = vld [vmem:[#allocation5 + $0xd08] sm:$0xff]  ;;  %v2109_v45 = vpack.c.bf16 %v725_v39, %v723_v37  ;;  %v487_v31 = vld [vmem:[#allocation5 + $0x580] sm:$0xff]  ;;  %v494_v37 = vld [vmem:[#allocation5 + $0x5b8] sm:$0xff] }
 0x128   : > { %v750_v39 = vld [vmem:[#allocation5 + $0xdb8] sm:$0xff]  ;;  %v299_v24 = vld [vmem:[%s2819_s14 + $0x20] sm:$0xff] }
 0x129   : > { %1834 = vmatpush1.bf16.msra.mxu1 %v1833_v48  ;;  %v473_v48 = vld [vmem:[#allocation5 + $0x510] sm:$0xff] }
 0x12a   : > { %2090 = vmatpush1.bf16.msra.mxu0 %v2089_v49  ;;  %1836 = vmatprep.subr.bf16.mxu1 %v1835_v50  ;;  %v727_v49 = vld [vmem:[#allocation5 + $0xd00] sm:$0xff]  ;;  %v2111_v50 = vpack.c.bf16 %v730_v43, %v728_v42  ;;  %v1857_v56 = vpack.c.bf16 %v473_v48, %v471_v47  ;;  %v1875_v42 = vpack.c.bf16 %v494_v37, %v492_v36  ;;  %v749_v47 = vld [vmem:[#allocation5 + $0xdb0] sm:$0xff]  ;;  %v496_v48 = vld [vmem:[#allocation5 + $0x5c8] sm:$0xff] }
 0x12b   : > { %2092 = vmatprep.subr.bf16.mxu0 %v2091_v54  ;;  %v732_v54 = vld [vmem:[#allocation5 + $0xd28] sm:$0xff]  ;;  %v2113_v57 = vpack.c.bf16 %v729_v51, %v727_v49  ;;  %v491_v43 = vld [vmem:[#allocation5 + $0x5a0] sm:$0xff]  ;;  %v498_v49 = vld [vmem:[#allocation5 + $0x5d8] sm:$0xff] }
 0x12c   : > { %v754_v51 = vld [vmem:[#allocation5 + $0xdd8] sm:$0xff]  ;;  %v768_v36 = vld [vmem:[#allocation5 + $0xe48] sm:$0xff] }
 0x12d   : > { %1838 = vmatpush1.bf16.msra.mxu1 %v1837_v60  ;;  %v477_v60 = vld [vmem:[#allocation5 + $0x530] sm:$0xff]  ;;  %v770_v37 = vld [vmem:[#allocation5 + $0xe58] sm:$0xff] }
 0x12e   : > { %2094 = vmatpush1.bf16.msra.mxu0 %v2093_v61  ;;  %1840 = vmatprep.subr.bf16.mxu1 %v1839_v62  ;;  %v731_v61 = vld [vmem:[#allocation5 + $0xd20] sm:$0xff]  ;;  %v2115_v62 = vpack.c.bf16 %v734_v55, %v732_v54  ;;  %v1861_v4 = vpack.c.bf16 %v477_v60, %v475_v59  ;;  %v1879_v54 = vpack.c.bf16 %v498_v49, %v496_v48  ;;  %v753_v59 = vld [vmem:[#allocation5 + $0xdd0] sm:$0xff]  ;;  %v500_v60 = vld [vmem:[#allocation5 + $0x5e8] sm:$0xff] }
 0x12f   : > { %2096 = vmatprep.subr.bf16.mxu0 %v2095_v2  ;;  %v736_v2 = vld [vmem:[#allocation5 + $0xd48] sm:$0xff]  ;;  %v2117_v5 = vpack.c.bf16 %v733_v63, %v731_v61  ;;  %v495_v55 = vld [vmem:[#allocation5 + $0x5c0] sm:$0xff]  ;;  %v502_v61 = vld [vmem:[#allocation5 + $0x5f8] sm:$0xff] }
 0x130   : > { %v758_v63 = vld [vmem:[#allocation5 + $0xdf8] sm:$0xff]  ;;  %v516_v48 = vld [vmem:[#allocation5 + $0x668] sm:$0xff] }
 0x131   : > { %1842 = vmatpush1.bf16.msra.mxu1 %v1841_v8  ;;  %v481_v8 = vld [vmem:[#allocation5 + $0x550] sm:$0xff]  ;;  %v518_v49 = vld [vmem:[#allocation5 + $0x678] sm:$0xff] }
 0x132   : > { %2098 = vmatpush1.bf16.msra.mxu0 %v2097_v9  ;;  %1844 = vmatprep.subr.bf16.mxu1 %v1843_v10  ;;  %v735_v9 = vld [vmem:[#allocation5 + $0xd40] sm:$0xff]  ;;  %v2119_v10 = vpack.c.bf16 %v738_v3, %v736_v2  ;;  %v1865_v16 = vpack.c.bf16 %v481_v8, %v479_v7  ;;  %v1883_v2 = vpack.c.bf16 %v502_v61, %v500_v60  ;;  %v757_v7 = vld [vmem:[#allocation5 + $0xdf0] sm:$0xff]  ;;  %v504_v8 = vld [vmem:[#allocation5 + $0x608] sm:$0xff] }
 0x133   : > { %2100 = vmatprep.subr.bf16.mxu0 %v2099_v14  ;;  %v740_v14 = vld [vmem:[#allocation5 + $0xd68] sm:$0xff]  ;;  %v2121_v17 = vpack.c.bf16 %v737_v11, %v735_v9  ;;  %v499_v3 = vld [vmem:[#allocation5 + $0x5e0] sm:$0xff]  ;;  %v506_v9 = vld [vmem:[#allocation5 + $0x618] sm:$0xff] }
 0x134   : > { %v762_v11 = vld [vmem:[#allocation5 + $0xe18] sm:$0xff]  ;;  %v520_v60 = vld [vmem:[#allocation5 + $0x688] sm:$0xff] }
 0x135   : > { %1846 = vmatpush1.bf16.msra.mxu1 %v1845_v20  ;;  %v485_v20 = vld [vmem:[#allocation5 + $0x570] sm:$0xff]  ;;  %v522_v61 = vld [vmem:[#allocation5 + $0x698] sm:$0xff] }
 0x136   : > { %2102 = vmatpush1.bf16.msra.mxu0 %v2101_v21  ;;  %1848 = vmatprep.subr.bf16.mxu1 %v1847_v22  ;;  %v739_v21 = vld [vmem:[#allocation5 + $0xd60] sm:$0xff]  ;;  %v2123_v22 = vpack.c.bf16 %v742_v15, %v740_v14  ;;  %v1869_v28 = vpack.c.bf16 %v485_v20, %v483_v19  ;;  %v1887_v14 = vpack.c.bf16 %v506_v9, %v504_v8  ;;  %v761_v19 = vld [vmem:[#allocation5 + $0xe10] sm:$0xff]  ;;  %v508_v20 = vld [vmem:[#allocation5 + $0x628] sm:$0xff] }
 0x137   : > { %2104 = vmatprep.subr.bf16.mxu0 %v2103_v26  ;;  %v744_v26 = vld [vmem:[#allocation5 + $0xd88] sm:$0xff]  ;;  %v2125_v29 = vpack.c.bf16 %v741_v23, %v739_v21  ;;  %v503_v15 = vld [vmem:[#allocation5 + $0x600] sm:$0xff]  ;;  %v510_v21 = vld [vmem:[#allocation5 + $0x638] sm:$0xff] }
 0x138   : > { %v766_v23 = vld [vmem:[#allocation5 + $0xe38] sm:$0xff]  ;;  %v524_v8 = vld [vmem:[#allocation5 + $0x6a8] sm:$0xff] }
 0x139   : > { %1850 = vmatpush1.bf16.msra.mxu1 %v1849_v32  ;;  %v489_v32 = vld [vmem:[#allocation5 + $0x590] sm:$0xff]  ;;  %v526_v9 = vld [vmem:[#allocation5 + $0x6b8] sm:$0xff] }
 0x13a   : > { %2106 = vmatpush1.bf16.msra.mxu0 %v2105_v33  ;;  %1852 = vmatprep.subr.bf16.mxu1 %v1851_v34  ;;  %v743_v33 = vld [vmem:[#allocation5 + $0xd80] sm:$0xff]  ;;  %v2127_v34 = vpack.c.bf16 %v746_v27, %v744_v26  ;;  %v1873_v40 = vpack.c.bf16 %v489_v32, %v487_v31 }
 0x13b   : > { %2108 = vmatprep.subr.bf16.mxu0 %v2107_v38  ;;  %v748_v38 = vld [vmem:[#allocation5 + $0xda8] sm:$0xff]  ;;  %v2129_v41 = vpack.c.bf16 %v745_v35, %v743_v33  ;;  %v307_v26 = vld [vmem:[%s2819_s14 + $0x60] sm:$0xff]  ;;  %v765_v33 = vld [vmem:[#allocation5 + $0xe30] sm:$0xff] }
 0x13c   : > { %v763_v31 = vld [vmem:[#allocation5 + $0xe20] sm:$0xff]  ;;  %v514_v35 = vld [vmem:[#allocation5 + $0x658] sm:$0xff] }
 0x13d   : > { %1854 = vmatpush1.bf16.msra.mxu1 %v1853_v44  ;;  %v493_v44 = vld [vmem:[#allocation5 + $0x5b0] sm:$0xff] }
 0x13e   : > { %2110 = vmatpush1.bf16.msra.mxu0 %v2109_v45  ;;  %1856 = vmatprep.subr.bf16.mxu1 %v1855_v46  ;;  %v747_v45 = vld [vmem:[#allocation5 + $0xda0] sm:$0xff]  ;;  %v2131_v46 = vpack.c.bf16 %v750_v39, %v748_v38  ;;  %v1877_v52 = vpack.c.bf16 %v493_v44, %v491_v43  ;;  %v302_v38 = vld [vmem:[%s2819_s14 + $0x38] sm:$0xff]  ;;  %v513_v44 = vld [vmem:[#allocation5 + $0x650] sm:$0xff] }
 0x13f   : > { %2112 = vmatprep.subr.bf16.mxu0 %v2111_v50  ;;  %v752_v50 = vld [vmem:[#allocation5 + $0xdc8] sm:$0xff]  ;;  %v2133_v53 = vpack.c.bf16 %v749_v47, %v747_v45  ;;  %v511_v43 = vld [vmem:[#allocation5 + $0x640] sm:$0xff]  ;;  %v769_v47 = vld [vmem:[#allocation5 + $0xe50] sm:$0xff] }
 0x140   : > { %v767_v45 = vld [vmem:[#allocation5 + $0xe40] sm:$0xff] }
 0x141   : > { %1858 = vmatpush1.bf16.msra.mxu1 %v1857_v56  ;;  %v497_v56 = vld [vmem:[#allocation5 + $0x5d0] sm:$0xff] }
 0x142   : > { %2114 = vmatpush1.bf16.msra.mxu0 %v2113_v57  ;;  %1860 = vmatprep.subr.bf16.mxu1 %v1859_v58  ;;  %v751_v57 = vld [vmem:[#allocation5 + $0xdc0] sm:$0xff]  ;;  %v2135_v58 = vpack.c.bf16 %v754_v51, %v752_v50  ;;  %v1881_v0 = vpack.c.bf16 %v497_v56, %v495_v55  ;;  %v772_v50 = vld [vmem:[#allocation5 + $0xe68] sm:$0xff]  ;;  %v774_v51 = vld [vmem:[#allocation5 + $0xe78] sm:$0xff] }
 0x143   : > { %2116 = vmatprep.subr.bf16.mxu0 %v2115_v62  ;;  %v756_v62 = vld [vmem:[#allocation5 + $0xde8] sm:$0xff]  ;;  %v2137_v1 = vpack.c.bf16 %v753_v59, %v751_v57  ;;  %v515_v55 = vld [vmem:[#allocation5 + $0x660] sm:$0xff]  ;;  %v517_v56 = vld [vmem:[#allocation5 + $0x670] sm:$0xff] }
 0x144   : > { %v771_v57 = vld [vmem:[#allocation5 + $0xe60] sm:$0xff]  ;;  %v773_v59 = vld [vmem:[#allocation5 + $0xe70] sm:$0xff] }
 0x145   : > { %1862 = vmatpush1.bf16.msra.mxu1 %v1861_v4  ;;  %v501_v4 = vld [vmem:[#allocation5 + $0x5f0] sm:$0xff] }
 0x146   : > { %2118 = vmatpush1.bf16.msra.mxu0 %v2117_v5  ;;  %1864 = vmatprep.subr.bf16.mxu1 %v1863_v6  ;;  %v755_v5 = vld [vmem:[#allocation5 + $0xde0] sm:$0xff]  ;;  %v2139_v6 = vpack.c.bf16 %v758_v63, %v756_v62  ;;  %v1885_v12 = vpack.c.bf16 %v501_v4, %v499_v3  ;;  %v776_v62 = vld [vmem:[#allocation5 + $0xe88] sm:$0xff]  ;;  %v778_v63 = vld [vmem:[#allocation5 + $0xe98] sm:$0xff] }
 0x147   : > { %2120 = vmatprep.subr.bf16.mxu0 %v2119_v10  ;;  %v760_v10 = vld [vmem:[#allocation5 + $0xe08] sm:$0xff]  ;;  %v2141_v13 = vpack.c.bf16 %v757_v7, %v755_v5  ;;  %v519_v3 = vld [vmem:[#allocation5 + $0x680] sm:$0xff]  ;;  %v521_v4 = vld [vmem:[#allocation5 + $0x690] sm:$0xff] }
 0x148   : > { %v775_v5 = vld [vmem:[#allocation5 + $0xe80] sm:$0xff]  ;;  %v777_v7 = vld [vmem:[#allocation5 + $0xe90] sm:$0xff] }
 0x149   : > { %1866 = vmatpush1.bf16.msra.mxu1 %v1865_v16  ;;  %v505_v16 = vld [vmem:[#allocation5 + $0x610] sm:$0xff] }
 0x14a   : > { %2122 = vmatpush1.bf16.msra.mxu0 %v2121_v17  ;;  %1868 = vmatprep.subr.bf16.mxu1 %v1867_v18  ;;  %v759_v17 = vld [vmem:[#allocation5 + $0xe00] sm:$0xff]  ;;  %v2143_v18 = vpack.c.bf16 %v762_v11, %v760_v10  ;;  %v1889_v25 = vpack.c.bf16 %v505_v16, %v503_v15  ;;  %v780_v10 = vld [vmem:[#allocation5 + $0xea8] sm:$0xff]  ;;  %v782_v11 = vld [vmem:[#allocation5 + $0xeb8] sm:$0xff] }
 0x14b   : > { %2124 = vmatprep.subr.bf16.mxu0 %v2123_v22  ;;  %v764_v22 = vld [vmem:[#allocation5 + $0xe28] sm:$0xff]  ;;  %v2145_v27 = vpack.c.bf16 %v761_v19, %v759_v17  ;;  %v523_v15 = vld [vmem:[#allocation5 + $0x6a0] sm:$0xff]  ;;  %v525_v16 = vld [vmem:[#allocation5 + $0x6b0] sm:$0xff] }
 0x14c   : > { %v2147_v32 = vpack.c.bf16 %v766_v23, %v764_v22  ;;  %v779_v17 = vld [vmem:[#allocation5 + $0xea0] sm:$0xff]  ;;  %v781_v19 = vld [vmem:[#allocation5 + $0xeb0] sm:$0xff]  ;;  %v784_v22 = vld [vmem:[#allocation5 + $0xec8] sm:$0xff] }
 0x14d   : > { %1870 = vmatpush1.bf16.msra.mxu1 %v1869_v28  ;;  %v1891_v28 = vpack.c.bf16 %v510_v21, %v508_v20  ;;  %v528_v20 = vld [vmem:[#allocation5 + $0x6c8] sm:$0xff]  ;;  %v530_v21 = vld [vmem:[#allocation5 + $0x6d8] sm:$0xff] }
 0x14e   : > { %2126 = vmatpush1.bf16.msra.mxu0 %v2125_v29  ;;  %1872 = vmatprep.subr.bf16.mxu1 %v1871_v30  ;;  %v507_v29 = vld [vmem:[#allocation5 + $0x620] sm:$0xff]  ;;  %v509_v30 = vld [vmem:[#allocation5 + $0x630] sm:$0xff]  ;;  %v786_v23 = vld [vmem:[#allocation5 + $0xed8] sm:$0xff] }
 0x14f   : > { %2128 = vmatprep.subr.bf16.mxu0 %v2127_v34  ;;  %v512_v34 = vld [vmem:[#allocation5 + $0x648] sm:$0xff]  ;;  %v1893_v39 = vpack.c.bf16 %v509_v30, %v507_v29  ;;  %v783_v29 = vld [vmem:[#allocation5 + $0xec0] sm:$0xff]  ;;  %v2167_v30 = vpack.c.bf16 %v786_v23, %v784_v22 }
 0x150   : > { %v547_v23 = vld [vmem:[#allocation5 + $0x760] sm:$0xff] }
 0x151   : > { %1874 = vmatpush1.bf16.msra.mxu1 %v1873_v40  ;;  %v310_v40 = vld [vmem:[%s2819_s14 + $0x78] sm:$0xff] }
 0x152   : > { %2130 = vmatpush1.bf16.msra.mxu0 %v2129_v41  ;;  %1876 = vmatprep.subr.bf16.mxu1 %v1875_v42  ;;  %v2149_v41 = vpack.c.bf16 %v765_v33, %v763_v31  ;;  %v1895_v42 = vpack.c.bf16 %v514_v35, %v512_v34  ;;  %v785_v31 = vld [vmem:[#allocation5 + $0xed0] sm:$0xff]  ;;  %v534_v33 = vld [vmem:[#allocation5 + $0x6f8] sm:$0xff]  ;;  %v788_v34 = vld [vmem:[#allocation5 + $0xee8] sm:$0xff] }
 0x153   : > { %2132 = vmatprep.subr.bf16.mxu0 %v2131_v46  ;;  %v2151_v46 = vpack.c.bf16 %v770_v37, %v768_v36  ;;  %v790_v35 = vld [vmem:[#allocation5 + $0xef8] sm:$0xff]  ;;  %v2169_v37 = vpack.c.bf16 %v785_v31, %v783_v29 }
 0x154   : > { %v554_v29 = vld [vmem:[#allocation5 + $0x798] sm:$0xff] }
 0x155   : > { %1878 = vmatpush1.bf16.msra.mxu1 %v1877_v52  ;;  %v1897_v52 = vpack.c.bf16 %v513_v44, %v511_v43  ;;  %v789_v43 = vld [vmem:[#allocation5 + $0xef0] sm:$0xff]  ;;  %v536_v44 = vld [vmem:[#allocation5 + $0x708] sm:$0xff]  ;;  %v810_v31 = vld [vmem:[#allocation5 + $0xf98] sm:$0xff] }
 0x156   : > { %2134 = vmatpush1.bf16.msra.mxu0 %v2133_v53  ;;  %1880 = vmatprep.subr.bf16.mxu1 %v1879_v54  ;;  %v2153_v53 = vpack.c.bf16 %v769_v47, %v767_v45  ;;  %v1899_v54 = vpack.c.bf16 %v518_v49, %v516_v48  ;;  %v538_v45 = vld [vmem:[#allocation5 + $0x718] sm:$0xff] }
 0x157   : > { %2136 = vmatprep.subr.bf16.mxu0 %v2135_v58  ;;  %v2155_v58 = vpack.c.bf16 %v774_v51, %v772_v50  ;;  %v794_v47 = vld [vmem:[#allocation5 + $0xf18] sm:$0xff]  ;;  %v1919_v50 = vpack.c.bf16 %v538_v45, %v536_v44  ;;  %v535_v51 = vld [vmem:[#allocation5 + $0x700] sm:$0xff] }
 0x159   : > { %1882 = vmatpush1.bf16.msra.mxu1 %v1881_v0  ;;  %v1901_v0 = vpack.c.bf16 %v517_v56, %v515_v55  ;;  %v793_v55 = vld [vmem:[#allocation5 + $0xf10] sm:$0xff]  ;;  %v540_v56 = vld [vmem:[#allocation5 + $0x728] sm:$0xff] }
 0x15a   : > { %2138 = vmatpush1.bf16.msra.mxu0 %v2137_v1  ;;  %1884 = vmatprep.subr.bf16.mxu1 %v1883_v2  ;;  %v2157_v1 = vpack.c.bf16 %v773_v59, %v771_v57  ;;  %v1903_v2 = vpack.c.bf16 %v522_v61, %v520_v60  ;;  %v542_v57 = vld [vmem:[#allocation5 + $0x738] sm:$0xff] }
 0x15b   : > { %2140 = vmatprep.subr.bf16.mxu0 %v2139_v6  ;;  %v2159_v6 = vpack.c.bf16 %v778_v63, %v776_v62  ;;  %v798_v59 = vld [vmem:[#allocation5 + $0xf38] sm:$0xff]  ;;  %v1923_v62 = vpack.c.bf16 %v542_v57, %v540_v56  ;;  %v539_v63 = vld [vmem:[#allocation5 + $0x720] sm:$0xff] }
 0x15d   : > { %1886 = vmatpush1.bf16.msra.mxu1 %v1885_v12  ;;  %v1905_v12 = vpack.c.bf16 %v521_v4, %v519_v3  ;;  %v797_v3 = vld [vmem:[#allocation5 + $0xf30] sm:$0xff]  ;;  %v544_v4 = vld [vmem:[#allocation5 + $0x748] sm:$0xff] }
 0x15e   : > { %2142 = vmatpush1.bf16.msra.mxu0 %v2141_v13  ;;  %1888 = vmatprep.subr.bf16.mxu1 %v1887_v14  ;;  %v2161_v13 = vpack.c.bf16 %v777_v7, %v775_v5  ;;  %v1907_v14 = vpack.c.bf16 %v526_v9, %v524_v8  ;;  %v546_v5 = vld [vmem:[#allocation5 + $0x758] sm:$0xff] }
 0x15f   : > { %2144 = vmatprep.subr.bf16.mxu0 %v2143_v18  ;;  %v2163_v18 = vpack.c.bf16 %v782_v11, %v780_v10  ;;  %v802_v7 = vld [vmem:[#allocation5 + $0xf58] sm:$0xff]  ;;  %v1927_v10 = vpack.c.bf16 %v546_v5, %v544_v4  ;;  %v543_v11 = vld [vmem:[#allocation5 + $0x740] sm:$0xff] }
 0x160   : > { %1042 = vmatmul.mubr.f32.vlgmr.msra.gmra.mrb[0].mxu1 %v299_v24  ;;  %v1909_v24 = vpack.c.bf16 %v525_v16, %v523_v15  ;;  %v801_v15 = vld [vmem:[#allocation5 + $0xf50] sm:$0xff]  ;;  %v548_v16 = vld [vmem:[#allocation5 + $0x768] sm:$0xff] }
 0x161   : > { %1890 = vmatpush1.bf16.msra.mxu1 %v1889_v25  ;;  %1326 = vmatmul.mubr.f32.vlgmr.msra.gmra.mrb[0].mxu0 %v307_v26  ;;  %v2165_v25 = vpack.c.bf16 %v781_v19, %v779_v17  ;;  %v1911_v26 = vpack.c.bf16 %v530_v21, %v528_v20  ;;  %v550_v17 = vld [vmem:[#allocation5 + $0x778] sm:$0xff] }
 0x162   : > { %2146 = vmatpush1.bf16.msra.mxu0 %v2145_v27  ;;  %1892 = vmatprep.subr.bf16.mxu1 %v1891_v28  ;;  %v527_v27 = vld [vmem:[#allocation5 + $0x6c0] sm:$0xff]  ;;  %v529_v28 = vld [vmem:[#allocation5 + $0x6d0] sm:$0xff]  ;;  %v806_v19 = vld [vmem:[#allocation5 + $0xf78] sm:$0xff]  ;;  %v1931_v22 = vpack.c.bf16 %v550_v17, %v548_v16 }
 0x163   : > { %2148 = vmatprep.subr.bf16.mxu0 %v2147_v32  ;;  %1112 = vmatprep.mubr.f32.mxu1 %v302_v38  ;;  %v532_v32 = vld [vmem:[#allocation5 + $0x6e8] sm:$0xff]  ;;  %v1913_v36 = vpack.c.bf16 %v529_v28, %v527_v27  ;;  %v805_v27 = vld [vmem:[#allocation5 + $0xf70] sm:$0xff] }
 0x164   : > { %1396 = vmatprep.mubr.f32.mxu0 %v310_v40  ;;  %v1915_v38 = vpack.c.bf16 %v534_v33, %v532_v32  ;;  %v533_v40 = vld [vmem:[#allocation5 + $0x6f0] sm:$0xff]  ;;  %v552_v28 = vld [vmem:[#allocation5 + $0x788] sm:$0xff] }
 0x165   : > { %1894 = vmatpush1.bf16.msra.mxu1 %v1893_v39  ;;  %v531_v39 = vld [vmem:[#allocation5 + $0x6e0] sm:$0xff] }
 0x166   : > { %2150 = vmatpush1.bf16.msra.mxu0 %v2149_v41  ;;  %1896 = vmatprep.subr.bf16.mxu1 %v1895_v42  ;;  %v787_v41 = vld [vmem:[#allocation5 + $0xee0] sm:$0xff]  ;;  %v2171_v42 = vpack.c.bf16 %v790_v35, %v788_v34  ;;  %v1917_v48 = vpack.c.bf16 %v533_v40, %v531_v39  ;;  %v1935_v34 = vpack.c.bf16 %v554_v29, %v552_v28  ;;  %v809_v39 = vld [vmem:[#allocation5 + $0xf90] sm:$0xff]  ;;  %v556_v40 = vld [vmem:[#allocation5 + $0x7a8] sm:$0xff] }
 0x167   : > { %2152 = vmatprep.subr.bf16.mxu0 %v2151_v46  ;;  %v792_v46 = vld [vmem:[#allocation5 + $0xf08] sm:$0xff]  ;;  %v2173_v49 = vpack.c.bf16 %v789_v43, %v787_v41  ;;  %v551_v35 = vld [vmem:[#allocation5 + $0x780] sm:$0xff]  ;;  %v558_v41 = vld [vmem:[#allocation5 + $0x7b8] sm:$0xff] }
 0x168   : > { %v814_v43 = vld [vmem:[#allocation5 + $0xfb8] sm:$0xff]  ;;  %v1405_v17 = vld [vmem:[#allocation8] sm:$0xff]  ;;  %v1426_v28 = vld [vmem:[#allocation8 + $0xa8] sm:$0xff] }
 0x169   : > { %1898 = vmatpush1.bf16.msra.mxu1 %v1897_v52  ;;  %v537_v52 = vld [vmem:[#allocation5 + $0x710] sm:$0xff] }
 0x16a   : > { %2154 = vmatpush1.bf16.msra.mxu0 %v2153_v53  ;;  %1900 = vmatprep.subr.bf16.mxu1 %v1899_v54  ;;  %v791_v53 = vld [vmem:[#allocation5 + $0xf00] sm:$0xff]  ;;  %v2175_v54 = vpack.c.bf16 %v794_v47, %v792_v46  ;;  %v1921_v60 = vpack.c.bf16 %v537_v52, %v535_v51  ;;  %v1939_v46 = vpack.c.bf16 %v558_v41, %v556_v40  ;;  %v813_v51 = vld [vmem:[#allocation5 + $0xfb0] sm:$0xff]  ;;  %v560_v52 = vld [vmem:[#allocation5 + $0x7c8] sm:$0xff] }
 0x16b   : > { %2156 = vmatprep.subr.bf16.mxu0 %v2155_v58  ;;  %v796_v58 = vld [vmem:[#allocation5 + $0xf28] sm:$0xff]  ;;  %v2177_v61 = vpack.c.bf16 %v793_v55, %v791_v53  ;;  %v555_v47 = vld [vmem:[#allocation5 + $0x7a0] sm:$0xff]  ;;  %v562_v53 = vld [vmem:[#allocation5 + $0x7d8] sm:$0xff] }
 0x16c   : > { %v818_v55 = vld [vmem:[#allocation5 + $0xfd8] sm:$0xff]  ;;  %v1430_v40 = vld [vmem:[#allocation8 + $0xc8] sm:$0xff] }
 0x16d   : > { %1902 = vmatpush1.bf16.msra.mxu1 %v1901_v0  ;;  %v541_v0 = vld [vmem:[#allocation5 + $0x730] sm:$0xff] }
 0x16e   : > { %2158 = vmatpush1.bf16.msra.mxu0 %v2157_v1  ;;  %1904 = vmatprep.subr.bf16.mxu1 %v1903_v2  ;;  %v795_v1 = vld [vmem:[#allocation5 + $0xf20] sm:$0xff]  ;;  %v2179_v2 = vpack.c.bf16 %v798_v59, %v796_v58  ;;  %v1925_v8 = vpack.c.bf16 %v541_v0, %v539_v63  ;;  %v1943_v58 = vpack.c.bf16 %v562_v53, %v560_v52  ;;  %v817_v63 = vld [vmem:[#allocation5 + $0xfd0] sm:$0xff]  ;;  %v564_v0 = vld [vmem:[#allocation5 + $0x7e8] sm:$0xff] }
 0x16f   : > { %2160 = vmatprep.subr.bf16.mxu0 %v2159_v6  ;;  %v800_v6 = vld [vmem:[#allocation5 + $0xf48] sm:$0xff]  ;;  %v2181_v9 = vpack.c.bf16 %v797_v3, %v795_v1  ;;  %v559_v59 = vld [vmem:[#allocation5 + $0x7c0] sm:$0xff]  ;;  %v566_v1 = vld [vmem:[#allocation5 + $0x7f8] sm:$0xff] }
 0x170   : > { %v822_v3 = vld [vmem:[#allocation5 + $0xff8] sm:$0xff]  ;;  %v1433_v52 = vld [vmem:[#allocation8 + $0xe0] sm:$0xff]  ;;  %v1434_v53 = vld [vmem:[#allocation8 + $0xe8] sm:$0xff] }
 0x171   : > { %1906 = vmatpush1.bf16.msra.mxu1 %v1905_v12  ;;  %v545_v12 = vld [vmem:[#allocation5 + $0x750] sm:$0xff] }
 0x172   : > { %2162 = vmatpush1.bf16.msra.mxu0 %v2161_v13  ;;  %1908 = vmatprep.subr.bf16.mxu1 %v1907_v14  ;;  %v799_v13 = vld [vmem:[#allocation5 + $0xf40] sm:$0xff]  ;;  %v2183_v14 = vpack.c.bf16 %v802_v7, %v800_v6  ;;  %v1929_v20 = vpack.c.bf16 %v545_v12, %v543_v11  ;;  %v1947_v6 = vpack.c.bf16 %v566_v1, %v564_v0  ;;  %v821_v11 = vld [vmem:[#allocation5 + $0xff0] sm:$0xff]  ;;  %v825_v0 = vlaneseq }
 0x173   : > { %2164 = vmatprep.subr.bf16.mxu0 %v2163_v18  ;;  %v804_v18 = vld [vmem:[#allocation5 + $0xf68] sm:$0xff]  ;;  %v2185_v21 = vpack.c.bf16 %v801_v15, %v799_v13  ;;  %v563_v7 = vld [vmem:[#allocation5 + $0x7e0] sm:$0xff] }
 0x174   : > { %v1421_v12 = vld [vmem:[#allocation8 + $0x80] sm:$0xff]  ;;  %v1422_v13 = vld [vmem:[#allocation8 + $0x88] sm:$0xff]  ;;  %v826_v1 = vshrl.u32 %v825_v0, 7 }
 0x175   : > { %1910 = vmatpush1.bf16.msra.mxu1 %v1909_v24  ;;  %v549_v24 = vld [vmem:[#allocation5 + $0x770] sm:$0xff]  ;;  %v2207_v16 = vpack.c.bf16 %v1422_v13, %v1421_v12 }
 0x176   : > { %2166 = vmatpush1.bf16.msra.mxu0 %v2165_v25  ;;  %1912 = vmatprep.subr.bf16.mxu1 %v1911_v26  ;;  %v803_v25 = vld [vmem:[#allocation5 + $0xf60] sm:$0xff]  ;;  %v2187_v26 = vpack.c.bf16 %v806_v19, %v804_v18  ;;  %v1933_v32 = vpack.c.bf16 %v549_v24, %v547_v23  ;;  %v1406_v18 = vld [vmem:[#allocation8 + $0x8] sm:$0xff]  ;;  %v1423_v19 = vld [vmem:[#allocation8 + $0x90] sm:$0xff] }
 0x177   : > { %2168 = vmatprep.subr.bf16.mxu0 %v2167_v30  ;;  %v808_v30 = vld [vmem:[#allocation5 + $0xf88] sm:$0xff]  ;;  %v2189_v33 = vpack.c.bf16 %v805_v27, %v803_v25  ;;  %v309_v23 = vld [vmem:[%s2819_s14 + $0x70] sm:$0xff] }
 0x178   : > { %v1407_v25 = vld [vmem:[#allocation8 + $0x10] sm:$0xff]  ;;  %v1425_v27 = vld [vmem:[#allocation8 + $0xa0] sm:$0xff] }
 0x179   : > { %1914 = vmatpush1.bf16.msra.mxu1 %v1913_v36  ;;  %v553_v36 = vld [vmem:[#allocation5 + $0x790] sm:$0xff] }
 0x17a   : > { %2170 = vmatpush1.bf16.msra.mxu0 %v2169_v37  ;;  %1916 = vmatprep.subr.bf16.mxu1 %v1915_v38  ;;  %v807_v37 = vld [vmem:[#allocation5 + $0xf80] sm:$0xff]  ;;  %v2191_v38 = vpack.c.bf16 %v810_v31, %v808_v30  ;;  %v1937_v44 = vpack.c.bf16 %v553_v36, %v551_v35  ;;  %v2215_v30 = vpack.c.bf16 %v1426_v28, %v1425_v27 }
 0x17b   : > { %2172 = vmatprep.subr.bf16.mxu0 %v2171_v42  ;;  %v812_v42 = vld [vmem:[#allocation5 + $0xfa8] sm:$0xff]  ;;  %v2193_v45 = vpack.c.bf16 %v809_v39, %v807_v37  ;;  %v1411_v37 = vld [vmem:[#allocation8 + $0x30] sm:$0xff] }
 0x17c   : > { %v1409_v31 = vld [vmem:[#allocation8 + $0x20] sm:$0xff] }
 0x17d   : > { %1918 = vmatpush1.bf16.msra.mxu1 %v1917_v48  ;;  %v557_v48 = vld [vmem:[#allocation5 + $0x7b0] sm:$0xff]  ;;  %v1429_v39 = vld [vmem:[#allocation8 + $0xc0] sm:$0xff] }
 0x17e   : > { %2174 = vmatpush1.bf16.msra.mxu0 %v2173_v49  ;;  %1920 = vmatprep.subr.bf16.mxu1 %v1919_v50  ;;  %v811_v49 = vld [vmem:[#allocation5 + $0xfa0] sm:$0xff]  ;;  %v2195_v50 = vpack.c.bf16 %v814_v43, %v812_v42  ;;  %v1941_v56 = vpack.c.bf16 %v557_v48, %v555_v47  ;;  %v2223_v42 = vpack.c.bf16 %v1430_v40, %v1429_v39 }
 0x17f   : > { %2176 = vmatprep.subr.bf16.mxu0 %v2175_v54  ;;  %v816_v54 = vld [vmem:[#allocation5 + $0xfc8] sm:$0xff]  ;;  %v2197_v57 = vpack.c.bf16 %v813_v51, %v811_v49  ;;  %v1415_v49 = vld [vmem:[#allocation8 + $0x50] sm:$0xff] }
 0x180   : > { %v1413_v43 = vld [vmem:[#allocation8 + $0x40] sm:$0xff] }
 0x181   : > { %1922 = vmatpush1.bf16.msra.mxu1 %v1921_v60  ;;  %v561_v60 = vld [vmem:[#allocation5 + $0x7d0] sm:$0xff] }
 0x182   : > { %2178 = vmatpush1.bf16.msra.mxu0 %v2177_v61  ;;  %1924 = vmatprep.subr.bf16.mxu1 %v1923_v62  ;;  %v815_v61 = vld [vmem:[#allocation5 + $0xfc0] sm:$0xff]  ;;  %v2199_v62 = vpack.c.bf16 %v818_v55, %v816_v54  ;;  %v1945_v4 = vpack.c.bf16 %v561_v60, %v559_v59  ;;  %v2231_v54 = vpack.c.bf16 %v1434_v53, %v1433_v52 }
 0x183   : > { %2180 = vmatprep.subr.bf16.mxu0 %v2179_v2  ;;  %v820_v2 = vld [vmem:[#allocation5 + $0xfe8] sm:$0xff]  ;;  %v2201_v5 = vpack.c.bf16 %v817_v63, %v815_v61  ;;  %v1436_v59 = vld [vmem:[#allocation8 + $0xf8] sm:$0xff]  ;;  %v1419_v61 = vld [vmem:[#allocation8 + $0x70] sm:$0xff] }
 0x184   : > { %v1417_v55 = vld [vmem:[#allocation8 + $0x60] sm:$0xff] }
 0x185   : > { %1926 = vmatpush1.bf16.msra.mxu1 %v1925_v8  ;;  %v565_v8 = vld [vmem:[#allocation5 + $0x7f0] sm:$0xff] }
 0x186   : > { %2182 = vmatpush1.bf16.msra.mxu0 %v2181_v9  ;;  %1928 = vmatprep.subr.bf16.mxu1 %v1927_v10  ;;  %v819_v9 = vld [vmem:[#allocation5 + $0xfe0] sm:$0xff]  ;;  %v2203_v10 = vpack.c.bf16 %v822_v3, %v820_v2  ;;  %v827_v2 = vsub.s32 0, %v826_v1 }
 0x187   : > { %2184 = vmatprep.subr.bf16.mxu0 %v2183_v14  ;;  %v1949_v14 = vpack.c.bf16 %v565_v8, %v563_v7  ;;  %v2205_v15 = vpack.c.bf16 %v821_v11, %v819_v9  ;;  %v823_v3 = vld [vmem:[#allocation7] sm:$0x3] }
 0x189   : > { %1930 = vmatpush1.bf16.msra.mxu1 %v1929_v20  ;;  %v1424_v20 = vld [vmem:[#allocation8 + $0x98] sm:$0xff] }
 0x18a   : > { %2186 = vmatpush1.bf16.msra.mxu0 %v2185_v21  ;;  %1932 = vmatprep.subr.bf16.mxu1 %v1931_v22  ;;  %v301_v21 = vld [vmem:[%s2819_s14 + $0x30] sm:$0xff]  ;;  %v2209_v22 = vpack.c.bf16 %v1406_v18, %v1405_v17  ;;  %v2211_v24 = vpack.c.bf16 %v1424_v20, %v1423_v19  ;;  %v1654_v18 = vld [vmem:[#allocation10] ss:$0 sm:$0xff] }
 0x18b   : > { %2188 = vmatprep.subr.bf16.mxu0 %v2187_v26  ;;  %v1408_v26 = vld [vmem:[#allocation8 + $0x18] sm:$0xff] }
 0x18c   : > { %v2213_v29 = vpack.c.bf16 %v1408_v26, %v1407_v25 }
 0x18d   : > { %1934 = vmatpush1.bf16.msra.mxu1 %v1933_v32  ;;  %v1410_v32 = vld [vmem:[#allocation8 + $0x28] sm:$0xff] }
 0x18e   : > { %2190 = vmatpush1.bf16.msra.mxu0 %v2189_v33  ;;  %1936 = vmatprep.subr.bf16.mxu1 %v1935_v34  ;;  %v1427_v33 = vld [vmem:[#allocation8 + $0xb0] sm:$0xff]  ;;  %v1428_v34 = vld [vmem:[#allocation8 + $0xb8] sm:$0xff]  ;;  %v2217_v35 = vpack.c.bf16 %v1410_v32, %v1409_v31 }
 0x18f   : > { %2192 = vmatprep.subr.bf16.mxu0 %v2191_v38  ;;  %v2219_v36 = vpack.c.bf16 %v1428_v34, %v1427_v33  ;;  %v1412_v38 = vld [vmem:[#allocation8 + $0x38] sm:$0xff] }
 0x190   : > { %v2221_v41 = vpack.c.bf16 %v1412_v38, %v1411_v37 }
 0x191   : > { %1938 = vmatpush1.bf16.msra.mxu1 %v1937_v44  ;;  %v1414_v44 = vld [vmem:[#allocation8 + $0x48] sm:$0xff] }
 0x192   : > { %2194 = vmatpush1.bf16.msra.mxu0 %v2193_v45  ;;  %1940 = vmatprep.subr.bf16.mxu1 %v1939_v46  ;;  %v1431_v45 = vld [vmem:[#allocation8 + $0xd0] sm:$0xff]  ;;  %v1432_v46 = vld [vmem:[#allocation8 + $0xd8] sm:$0xff]  ;;  %v2225_v47 = vpack.c.bf16 %v1414_v44, %v1413_v43 }
 0x193   : > { %2196 = vmatprep.subr.bf16.mxu0 %v2195_v50  ;;  %v2227_v48 = vpack.c.bf16 %v1432_v46, %v1431_v45  ;;  %v1416_v50 = vld [vmem:[#allocation8 + $0x58] sm:$0xff] }
 0x194   : > { %v2229_v51 = vpack.c.bf16 %v1416_v50, %v1415_v49 }
 0x195   : > { %1942 = vmatpush1.bf16.msra.mxu1 %v1941_v56  ;;  %v1418_v56 = vld [vmem:[#allocation8 + $0x68] sm:$0xff] }
 0x196   : > { %2198 = vmatpush1.bf16.msra.mxu0 %v2197_v57  ;;  %1944 = vmatprep.subr.bf16.mxu1 %v1943_v58  ;;  %v2233_v57 = vpack.c.bf16 %v1418_v56, %v1417_v55  ;;  %v1435_v58 = vld [vmem:[#allocation8 + $0xf0] sm:$0xff] }
 0x197   : > { %2200 = vmatprep.subr.bf16.mxu0 %v2199_v62  ;;  %v2235_v60 = vpack.c.bf16 %v1436_v59, %v1435_v58  ;;  %v1420_v62 = vld [vmem:[#allocation8 + $0x78] sm:$0xff] }
 0x198   : > { %v2237_v63 = vpack.c.bf16 %v1420_v62, %v1419_v61 }
 0x199   : > { %1946 = vmatpush1.bf16.msra.mxu1 %v1945_v4  ;;  %v831_v4 = vsub.s32 1, %v826_v1 }
 0x19a   : > { %2202 = vmatpush1.bf16.msra.mxu0 %v2201_v5  ;;  %1948 = vmatprep.subr.bf16.mxu1 %v1947_v6  ;;  %v828_v5 = vrot.slane %v823_v3, %v827_v2 }
 0x19b   : > { %2204 = vmatprep.subr.bf16.mxu0 %v2203_v10  ;;  %v832_v6 = vrot.slane %v823_v3, %v831_v4 }
 0x19d   : > { %1950 = vmatpush1.bf16.msra.mxu1 %v1949_v14 }
 0x19e   : > { %2206 = vmatpush1.bf16.msra.mxu0 %v2205_v15  ;;  %2208 = vmatprep.subr.bf16.mxu1 %v2207_v16 }
 0x1a0   : > { %1113 = vmatmul.mubr.f32.vlgmr.msra.gmra.mrb[0].mxu1 %v301_v21 }
 0x1a1   : > { %1397 = vmatmul.mubr.f32.vlgmr.msra.gmra.mrb[0].mxu0 %v309_v23  ;;  %2210 = vmatpush3.bf16.msra.mxu1 %v2209_v22 }
 0x1a2   : > { %2212 = vmatprep.subr.bf16.mxu1 %v2211_v24 }
 0x1a5   : > { %2214 = vmatpush3.bf16.msra.mxu1 %v2213_v29 }
 0x1a6   : > { %2216 = vmatprep.subr.bf16.mxu1 %v2215_v30 }
 0x1a9   : > { %2218 = vmatpush3.bf16.msra.mxu1 %v2217_v35 }
 0x1aa   : > { %2220 = vmatprep.subr.bf16.mxu1 %v2219_v36 }
 0x1ad   : > { %2222 = vmatpush3.bf16.msra.mxu1 %v2221_v41 }
 0x1ae   : > { %2224 = vmatprep.subr.bf16.mxu1 %v2223_v42 }
 0x1b1   : > { %2226 = vmatpush3.bf16.msra.mxu1 %v2225_v47 }
 0x1b2   : > { %2228 = vmatprep.subr.bf16.mxu1 %v2227_v48 }
 0x1b5   : > { %2230 = vmatpush3.bf16.msra.mxu1 %v2229_v51 }
 0x1b6   : > { %2232 = vmatprep.subr.bf16.mxu1 %v2231_v54 }
 0x1b9   : > { %2234 = vmatpush3.bf16.msra.mxu1 %v2233_v57 }
 0x1ba   : > { %2236 = vmatprep.subr.bf16.mxu1 %v2235_v60 }
 0x1bd   : > { %2238 = vmatpush3.bf16.msra.mxu1 %v2237_v63 }
 0x273   : > { %v1114_v7 = vpop.f32.mrb[0].mxu1 }
 0x274   : > { %v2239_v8 = vadd.f32 %v1114_v7, %v828_v5  ;;  %v1398_v9 = vpop.f32.mrb[0].mxu0  ;;  %v1116_v10 = vpop.f32.mrb[1].mxu1 }
 0x275   : > { %v2241_v11 = vadd.f32 %v1116_v10, %v832_v6  ;;  %v1400_v12 = vpop.f32.mrb[1].mxu0 }
 0x276   : > { %v2240_v13 = vadd.f32 %v2239_v8, %v1398_v9 }
 0x277   : > { %v2242_v14 = vadd.f32 %v2241_v11, %v1400_v12 }
 0x278   : > { %v1403_v16 = vmax.f32 %v2240_v13, 0.0 }
 0x279   : > { %v1404_v15 = vmax.f32 %v2242_v14, 0.0 }
 0x27b   : > { %1508 = vmatprep.mubr.f32.mxu1 %v1404_v15 }
 0x27c   : > { %1509 = vmatmul.mubr.f32.vlgmr.msra.gmra.mrb[2].mxu1 %v1403_v16 }
 0x34f   : > { %v1692_v17 = vpop.f32.mrb[2].mxu1 }
 0x350   : > { %v1693_v19 = vpop.f32.mrb[3].mxu1 }
 0x351   : > { %v1694_v20 = vadd.f32 %v1693_v19, %v1692_v17 }
 0x353   : > { %v1511_v21 = vadd.f32 %v1694_v20, %v1654_v18 }
 0x355   : > { %1514 = vst [vmem:[%s294_s22] sm:$0xff] %v1511_v21 }
 0x356   : > { %2501 = shalt.err (!%p2498_p12)
}
 0x357   : > { %s2502_s30 = scalar_lea.hbm %s2854_s9, 128  ;;  %s2506_s8 = scalar_lea.hbm %s2902_s5, 384 }
 0x358   : > { %p2503_p13 = scmp.ne.s32.totalorder %s2854_s9, %s2502_s30  ;;  %p2507_p8 = scmp.lt.u32.totalorder %s2854_s9, %s2902_s5 }
 0x359   : > { %p2508_p9 = scmp.lt.u32.totalorder %s2506_s8, %s2502_s30  ;;  %p2510_p5 = scmp.lt.u32.totalorder %s2502_s30, %s2854_s9 }
 0x35a   : > { %p2504_p1 = pnand %p2503_p13, %p2920_p0 }
 0x35b   : > { %p2509_p7 = por %p2508_p9, %p2507_p8 }
 0x35c   : > { %p2505_p6 = pneg %p2504_p1 }
 0x35d   : > { %p2511_p2 = por %p2510_p5, %p2509_p7 }
 0x35f   : > { %p2512_p4 = pnand %p2511_p2, %p2505_p6 }
 0x361   : > { %2515 = shalt.err (!%p2512_p4)
}
 0x362   : > { %2273 = dma.vmem_to_hbm [thread:$0]  (%p2920_p0), %s2856_s26, 128, %s2854_s9, %s1516_s15  }
 0x363 PF: > { %p2305_p10 = scmp.ge.s32.totalorder %s2562_s21, 2  ;;  %s1541_s10 = sand.u32 1, %s2550_s18  }
 0x364   : > { %p2921_p11 = scmp.ne.s32.totalorder %s2913_s13, 0  ;;  %s1542_s22 = scalar_lea.sflag [#allocation4], %s1541_s10 }
 0x366   : > { %p2293_p3 = pnand %p2305_p10, %p2921_p11 }
 0x368   : > { %2545 = dma.done.wait (!%p2293_p3), %s1542_s22, 128  }
 0x369   : > { %2547 = vsyncadd (!%p2293_p3), %s1542_s22, 4294967168  ;;  %p20_p12 = scmp.ge.s32.totalorder %s2739_s28, 5   ;;  %s2922_s18 = smov %s2554_s19 }
 0x36a   : > { %s2923_s19 = smov %s2558_s20  ;;  %s2924_s20 = smov %s2750_s27 }
 0x36b   : > { %s2925_s21 = smov %s2739_s28  ;;  %22 = sbr.rel (!%p20_p12) target bundleno = 7 (0x7), region = 101 }
 0x372   :  { %1547 = vsyncpa [#allocation3], 1 }
 0x373   :  { %1549 = vsyncpa [#allocation3 + $0x1], 1 }
 0x374   :  { %1550 = vsyncpa [#allocation6], 1 }
 0x375   :  { %1551 = vsyncpa [#allocation9], 1 }
 0x376   :  { %1552 = vsyncpa [#allocation4], 1 }
 0x377   :  { %1554 = vsyncpa [#allocation4 + $0x1], 1 }

</bundles_post_ra>
